<compile_context>
chip_gen: v7x
topology: tpu7x:2x2x1
jax: 0.10.0
libtpu: 0.0.40
codegen_flags: <defaults>
</compile_context>

<pallas_src>
import functools

import jax
import jax.numpy as jnp
from jax import lax
from jax.experimental import pallas as pl
from jax.experimental.pallas import tpu as pltpu

_BN_EPS = 1e-5  # nn.BatchNorm2d default


def _round_up(x, m):
    return (x + m - 1) // m * m


def _layer_pass_kernel(x_ref, w_ref, scale_ref, shift_ref, *out_refs,
                       n_valid, tile_n, tiles_per_split, first_layer,
                       last_layer, bf16_matmul, masked_tiles):
    """One MLP layer, streamed over point rows.

    x_ref     : (1, tile_n, Cin)   pre-BN activation of the previous layer
                                   (raw input features if first_layer)
    w_ref     : (Cin, Cout_p)      layer weight (conv bias dropped: cancels in BN)
    scale_ref : (1, Cin)           folded BN scale of the previous layer
    shift_ref : (1, Cin)           folded BN shift of the previous layer
    out_refs:
      non-last layer: (y_ref (1,tile_n,Cout_p), stats_ref (1,2,Cout_p))
      last layer:     (stats_ref (1,2,Cout_p),  mm_ref   (1,2,Cout_p))
                      mm rows = [max(y), max(-y)] per channel, per batch.
    """
    if last_layer:
        stats_ref, mm_ref = out_refs
        y_ref = None
    else:
        y_ref, stats_ref = out_refs
        mm_ref = None

    s_id = pl.program_id(0)            # row split (keeps both v7x cores busy)
    t_id = pl.program_id(2)            # row tile inside the split
    tile_idx = s_id * tiles_per_split + t_id

    @pl.when(t_id == 0)
    def _init():
        stats_ref[...] = jnp.zeros(stats_ref.shape, stats_ref.dtype)
        if last_layer:
            mm_ref[...] = jnp.full(mm_ref.shape, -jnp.inf, mm_ref.dtype)

    def body(mask_rows):
        x = x_ref[0].astype(jnp.float32)                     # (tile_n, Cin)
        if first_layer:
            h = x                                            # no previous BN
        else:
            # Previous layer's BN (batch stats folded to scale/shift in the
            # wrapper) + ReLU.  Elementwise math stays f32.
            h = jnp.maximum(x * scale_ref[...] + shift_ref[...], 0.0)

        if mask_rows:
            row = (lax.broadcasted_iota(jnp.int32, (tile_n, 1), 0)
                   + tile_idx * tile_n)
            valid = row < n_valid
            if not first_layer:
                # Padded rows would otherwise become relu(shift) != 0 and
                # pollute batch statistics / downstream activations.
                h = jnp.where(valid, h, 0.0)

        if bf16_matmul:
            h = h.astype(jnp.bfloat16)
        y = jnp.dot(h, w_ref[...], preferred_element_type=jnp.float32)

        if y_ref is not None:
            y_ref[0] = y.astype(y_ref.dtype)                 # bf16 stream-out

        # Per-batch partial BN statistics; single (2, Cout_p) RMW per step.
        sums = jnp.concatenate(
            [jnp.sum(y, axis=0, keepdims=True),
             jnp.sum(y * y, axis=0, keepdims=True)], axis=0)
        stats_ref[0] = stats_ref[0] + sums

        if last_layer:
            # relu(scale*y + shift) is monotone in y, so the max over points
            # only needs per-channel running max / min of the pre-BN y.
            if mask_rows:
                y_hi = jnp.where(valid, y, -jnp.inf)
                y_lo = jnp.where(valid, -y, -jnp.inf)
            else:
                y_hi, y_lo = y, -y
            mm = jnp.concatenate(
                [jnp.max(y_hi, axis=0, keepdims=True),
                 jnp.max(y_lo, axis=0, keepdims=True)], axis=0)
            mm_ref[0] = jnp.maximum(mm_ref[0], mm)

    if masked_tiles:
        # Row masking only on tiles that contain padded rows; steady-state
        # tiles skip the iota/compare/select work entirely.
        is_pad_tile = (tile_idx + 1) * tile_n > n_valid

        @pl.when(jnp.logical_not(is_pad_tile))
        def _steady():
            body(False)

        @pl.when(is_pad_tile)
        def _tail():
            body(True)
    else:
        body(False)


def pointnet_set_abstraction_group_all(xyz, points, params, *, max_tile_n=1024,
                                       bf16_matmul=True,
                                       bf16_intermediates=None):
    """Forward pass of PointNetSetAbstraction with group_all=True.

    xyz    : [B, 3, N]  (PyTorch layout B, C, N)
    points : [B, D, N] or None
    params : list of (W[Cin,Cout], b[1,Cout], gamma[1,Cout], beta[1,Cout]);
             the conv bias b is accepted but unused (cancels under
             training-mode BatchNorm).
    Returns (new_xyz [B, 3, 1], new_points [B, mlp[-1], 1]).
    """
    assert len(params) >= 1
    if bf16_intermediates is None:
        bf16_intermediates = bf16_matmul
    B, C, N = xyz.shape
    L = len(params)

    # Channels-last features [B, N, 3+D].
    xyz_t = jnp.transpose(xyz, (0, 2, 1)).astype(jnp.float32)
    if points is not None:
        pts_t = jnp.transpose(points, (0, 2, 1)).astype(jnp.float32)
        feats = jnp.concatenate([xyz_t, pts_t], axis=-1)
    else:
        feats = xyz_t
    cin0 = feats.shape[-1]

    mlp_out = [w.shape[1] for (w, _, _, _) in params]
    cout_p = [_round_up(c, 128) for c in mlp_out]         # lane-dense channels
    w_bytes = 2 if bf16_matmul else 4
    w_dtype = jnp.bfloat16 if bf16_matmul else jnp.float32
    act_dtype = jnp.bfloat16 if bf16_intermediates else jnp.float32
    act_bytes = 2 if bf16_intermediates else 4

    # Generation-aware VMEM budget: v7x has 64 MiB per core, v5e/v6e have
    # 128 MiB -> deeper buffering and a larger limit on the big parts.
    try:
        vmem_cap = int(pltpu.get_tpu_info().vmem_capacity_bytes)
    except Exception:
        vmem_cap = 64 << 20                                # conservative (v7x)
    big_vmem = vmem_cap >= (100 << 20)
    n_buf = 3 if big_vmem else 2                           # streamed-ref depth
    vmem_limit_cap = (72 << 20) if big_vmem else (36 << 20)
    tile_budget = (vmem_limit_cap * 3) // 4

    # Row tiling: one shared padded row count n_pad, per-layer tile sizes that
    # divide it.  Tiny point sets collapse to a single tile.
    n16 = _round_up(N, 16)
    if n16 <= 128:
        candidates = [n16]
        t_min = n16
    else:
        candidates = [t for t in (1024, 512, 256, 128) if t <= max(128, max_tile_n)]
        t_min = candidates[-1]
    # Split the row axis across TensorCores when the batch axis alone cannot
    # feed both v7x cores.
    n_splits = 2 if (B == 1 and _round_up(N, t_min) // t_min >= 2) else 1
    n_pad = _round_up(N, t_min * n_splits)
    has_padding = n_pad != N
    m_total = B * N                                        # true BN row count

    def _layer_tile(cin, cin_bytes, cout_pad, store_y):
        def work_set(t):
            s = n_buf * t * cin * cin_bytes + 2 * cin * cout_pad * w_bytes
            if store_y:
                s += n_buf * t * cout_pad * act_bytes
            return s + 32 * cout_pad * 4
        for t in candidates:
            if n_pad % (t * n_splits) == 0 and work_set(t) <= tile_budget:
                return t, work_set(t)
        return t_min, work_set(t_min)

    feats = jnp.pad(feats, ((0, 0), (0, n_pad - N), (0, 0)))

    h_pre = feats                        # pre-BN activation feeding next pass
    scale = jnp.ones((1, cin0), jnp.float32)       # unused in the first pass
    shift = jnp.zeros((1, cin0), jnp.float32)
    out = None

    for i, (w, _b, gamma, beta) in enumerate(params):
        first_layer = i == 0
        last_layer = i == L - 1
        cin_i = h_pre.shape[-1]
        cin_bytes = h_pre.dtype.itemsize
        cout_i = mlp_out[i]
        cout_i_p = cout_p[i]
        store_y = not last_layer         # last layer: max/min folded, no y out

        tile_n, ws = _layer_tile(cin_i, cin_bytes, cout_i_p, store_y)
        n_tiles = n_pad // tile_n
        tiles_per = n_tiles // n_splits

        # Zero-pad the weight to lane-dense output channels; conv bias dropped
        # (it cancels exactly under training-mode BN).
        w_p = jnp.zeros((cin_i, cout_i_p), jnp.float32)
        w_p = w_p.at[:w.shape[0], :cout_i].set(w.astype(jnp.float32))
        w_p = w_p.astype(w_dtype)

        # First layer never needs row masking (zero-padded input, no previous
        # BN shift) unless it is also the last layer (max/min must exclude
        # padded rows).
        masked_tiles = has_padding and ((not first_layer) or last_layer)

        kernel = functools.partial(
            _layer_pass_kernel, n_valid=N, tile_n=tile_n,
            tiles_per_split=tiles_per, first_layer=first_layer,
            last_layer=last_layer, bf16_matmul=bf16_matmul,
            masked_tiles=masked_tiles)

        deep = n_buf > 2 and (n_splits * B * tiles_per) >= n_buf

        def _row_spec(block_shape, tp=tiles_per, deep=deep):
            kw = {"pipeline_mode": pl.Buffered(n_buf)} if deep else {}
            return pl.BlockSpec(block_shape,
                                lambda s, b, t, tp=tp: (b, s * tp + t, 0), **kw)

        stats_spec = pl.BlockSpec((1, 2, cout_i_p),
                                  lambda s, b, t, nb=B: (s * nb + b, 0, 0))
        in_specs = [
            _row_spec((1, tile_n, cin_i)),
            pl.BlockSpec((cin_i, cout_i_p), lambda s, b, t: (0, 0)),
            pl.BlockSpec((1, cin_i), lambda s, b, t: (0, 0)),
            pl.BlockSpec((1, cin_i), lambda s, b, t: (0, 0)),
        ]
        cparams = pltpu.CompilerParams(
            dimension_semantics=("parallel", "parallel", "arbitrary"),
            vmem_limit_bytes=int(min(vmem_limit_cap,
                                     max(12 << 20, ws + (4 << 20)))))
        grid = (n_splits, B, tiles_per)
        stats_shape = jax.ShapeDtypeStruct((n_splits * B, 2, cout_i_p),
                                           jnp.float32)

        if last_layer:
            stats_all, mm_all = pl.pallas_call(
                kernel, grid=grid, in_specs=in_specs,
                out_specs=(stats_spec,
                           pl.BlockSpec((1, 2, cout_i_p),
                                        lambda s, b, t, nb=B: (s * nb + b, 0, 0))),
                out_shape=(stats_shape, stats_shape),
                compiler_params=cparams,
            )(h_pre, w_p, scale, shift)
            y = None
        else:
            y, stats_all = pl.pallas_call(
                kernel, grid=grid, in_specs=in_specs,
                out_specs=(_row_spec((1, tile_n, cout_i_p)), stats_spec),
                out_shape=(jax.ShapeDtypeStruct((B, n_pad, cout_i_p), act_dtype),
                           stats_shape),
                compiler_params=cparams,
            )(h_pre, w_p, scale, shift)
            mm_all = None

        # Fold training-mode BN (biased variance, eps=1e-5) into scale/shift.
        # NOTE: one-pass E[y^2]-E[y]^2 can cancel for huge B*N / large means;
        # the max(.,0) clamp guards the rsqrt.  Padded channels get gamma=
        # beta=0 so they stay exactly 0 downstream.
        stats = jnp.sum(stats_all, axis=0)                  # (2, Cout_p)
        mean = stats[0] / m_total
        var = jnp.maximum(stats[1] / m_total - mean * mean, 0.0)
        gamma_p = jnp.zeros((cout_i_p,), jnp.float32).at[:cout_i].set(
            gamma.reshape(-1).astype(jnp.float32))
        beta_p = jnp.zeros((cout_i_p,), jnp.float32).at[:cout_i].set(
            beta.reshape(-1).astype(jnp.float32))
        scale_vec = gamma_p * lax.rsqrt(var + _BN_EPS)
        shift_vec = beta_p - mean * scale_vec

        if last_layer:
            mm = mm_all.reshape(n_splits, B, 2, cout_i_p).max(axis=0)
            y_max = mm[:, 0, :]                             # (B, Cout_p)
            y_min = -mm[:, 1, :]
            # relu(scale*y+shift) is monotone in y: max over points comes from
            # y_max when scale >= 0, else from y_min.
            y_star = jnp.where(scale_vec[None, :] >= 0.0, y_max, y_min)
            out = jnp.maximum(y_star * scale_vec[None, :] + shift_vec[None, :],
                              0.0)
        else:
            scale = scale_vec.reshape(1, cout_i_p)
            shift = shift_vec.reshape(1, cout_i_p)
            h_pre = y

    c_last = mlp_out[-1]
    new_points = out[:, :c_last][:, :, None]                # [B, C_last, 1]
    # sample_and_group_all: new_xyz = zeros [B, 1, C] -> permuted to [B, C, 1]
    new_xyz = jnp.zeros((B, C, 1), dtype=xyz.dtype)
    return new_xyz, new_points


def _reference_forward(xyz, points, params):
    """Pure-JAX f32 reference matching the PyTorch module (training-mode BN)."""
    x = jnp.transpose(xyz, (0, 2, 1)).astype(jnp.float32)
    if points is not None:
        x = jnp.concatenate(
            [x, jnp.transpose(points, (0, 2, 1)).astype(jnp.float32)], axis=-1)
    B, N, _ = x.shape
    h = x.reshape(B * N, -1)
    for (w, b, gamma, beta) in params:
        y = h @ w + b
        mean = jnp.mean(y, axis=0, keepdims=True)
        var = jnp.mean((y - mean) ** 2, axis=0, keepdims=True)
        h = jnp.maximum((y - mean) * lax.rsqrt(var + _BN_EPS) * gamma + beta, 0.0)
    c_last = params[-1][0].shape[1]
    return jnp.max(h.reshape(B, N, c_last), axis=1)          # [B, C_last]


def _make_params(key, in_channel, mlp, *, gamma_mixed_sign=False):
    """Conv2d 1x1 weight stored transposed as [in, out] + BN gamma/beta."""
    params = []
    last = in_channel
    for out_c in mlp:
        key, kw, kb, kg, kbt = jax.random.split(key, 5)
        w = 0.1 * jax.random.normal(kw, (last, out_c), dtype=jnp.float32)
        b = 0.1 * jax.random.normal(kb, (1, out_c), dtype=jnp.float32)
        if gamma_mixed_sign:
            g = 0.8 * jax.random.normal(kg, (1, out_c), dtype=jnp.float32)
        else:
            g = 1.0 + 0.1 * jax.random.normal(kg, (1, out_c), dtype=jnp.float32)
        bt = 0.1 * jax.random.normal(kbt, (1, out_c), dtype=jnp.float32)
        params.append((w, b, g, bt))
        last = out_c
    return params


if __name__ == "__main__":
    def run_case(key, *, B, N, D, mlp, bf16, tol, gamma_mixed_sign=False):
        k1, k2, k3 = jax.random.split(key, 3)
        xyz = jax.random.normal(k1, (B, 3, N), dtype=jnp.float32)
        points = (jax.random.normal(k2, (B, D, N), dtype=jnp.float32)
                  if D > 0 else None)
        params = _make_params(k3, 3 + D, mlp, gamma_mixed_sign=gamma_mixed_sign)
        fwd = jax.jit(functools.partial(
            pointnet_set_abstraction_group_all, bf16_matmul=bf16))
        new_xyz, new_points = fwd(xyz, points, params)
        jax.block_until_ready((new_xyz, new_points))
        assert new_xyz.shape == (B, 3, 1), new_xyz.shape
        assert new_points.shape == (B, mlp[-1], 1), new_points.shape
        assert bool(jnp.all(jnp.isfinite(new_points)))
        ref = _reference_forward(xyz, points, params)        # [B, C_last]
        err = float(jnp.max(jnp.abs(new_points[:, :, 0] - ref)))
        assert err < tol, f"B={B} N={N} mlp={mlp} bf16={bf16}: err={err}"

    key = jax.random.PRNGKey(0)
    k1, k2, k3 = jax.random.split(key, 3)
    # bf16 matmuls + bf16 intermediates; N not a multiple of the row tile.
    run_case(k1, B=2, N=300, D=5, mlp=[16, 32], bf16=True, tol=1e-1)
    # f32 validation path; B == 1 exercises the row-split (megacore) grid and
    # mixed-sign gammas exercise both branches of the monotone max/min fold.
    run_case(k2, B=1, N=200, D=4, mlp=[8, 24], bf16=False, tol=5e-3,
             gamma_mixed_sign=True)
    # points=None, single layer (first == last), single row tile, no padding.
    run_case(k3, B=2, N=64, D=0, mlp=[16], bf16=True, tol=1e-1)
    print("KERNEL_OK")
</pallas_src>

<mosaic_0001>
module attributes {stable_mosaic.version = 11 : i64} {
  func.func @_layer_pass_kernel(%arg0: i32, %arg1: i32, %arg2: i32, %arg3: memref<1x128x8xf32, #tpu.memory_space<vmem>>, %arg4: memref<8x128xbf16, #tpu.memory_space<vmem>>, %arg5: memref<1x8xf32, #tpu.memory_space<vmem>>, %arg6: memref<1x8xf32, #tpu.memory_space<vmem>>, %arg7: memref<1x128x128xbf16, #tpu.memory_space<vmem>>, %arg8: memref<1x2x128xf32, #tpu.memory_space<vmem>>) attributes {dimension_semantics = [#tpu.dimension_semantics<parallel>, #tpu.dimension_semantics<parallel>, #tpu.dimension_semantics<arbitrary>], iteration_bounds = array<i64: 1, 2, 3>, scalar_prefetch = 0 : i64, scratch_operands = 0 : i64, tpu.core_type = #tpu.core_type<tc>, window_params = [{transform_indices = @transform_0, window_bounds = array<i64: 1, 128, 8>}, {pipeline_mode = #tpu.pipeline_mode<synchronous>, transform_indices = @transform_1, window_bounds = array<i64: 8, 128>}, {pipeline_mode = #tpu.pipeline_mode<synchronous>, transform_indices = @transform_2, window_bounds = array<i64: 1, 8>}, {pipeline_mode = #tpu.pipeline_mode<synchronous>, transform_indices = @transform_3, window_bounds = array<i64: 1, 8>}, {transform_indices = @transform_4, window_bounds = array<i64: 1, 128, 128>}, {transform_indices = @transform_5, window_bounds = array<i64: 1, 2, 128>}]} {
    %c0_i32 = arith.constant 0 : i32
    %0 = arith.cmpi eq, %arg2, %c0_i32 : i32
    %1 = arith.extui %0 : i1 to i32
    %c0_i32_0 = arith.constant 0 : i32
    %2 = arith.cmpi ne, %1, %c0_i32_0 : i32
    scf.if %2 {
      %cst_16 = arith.constant 0.000000e+00 : f32
      %24 = vector.broadcast %cst_16 : f32 to vector<1x2x128xf32>
      %c0_17 = arith.constant 0 : index
      %c0_18 = arith.constant 0 : index
      %c0_19 = arith.constant 0 : index
      %25 = vector.load %arg8[%c0_17, %c0_18, %c0_19] : memref<1x2x128xf32, #tpu.memory_space<vmem>>, vector<1x2x128xf32>
      tpu.vector_store %arg8[%c0_17, %c0_18, %c0_19], %24 {strides = array<i32>} : memref<1x2x128xf32, #tpu.memory_space<vmem>>, vector<1x2x128xf32>,
    } else {
    }
    %c0 = arith.constant 0 : index
    %c0_1 = arith.constant 0 : index
    %c0_2 = arith.constant 0 : index
    %3 = vector.load %arg3[%c0, %c0_1, %c0_2] : memref<1x128x8xf32, #tpu.memory_space<vmem>>, vector<1x128x8xf32>
    %4 = vector.shape_cast %3 : vector<1x128x8xf32> to vector<128x8xf32>
    %5 = arith.truncf %4 : vector<128x8xf32> to vector<128x8xbf16>
    %c0_3 = arith.constant 0 : index
    %c0_4 = arith.constant 0 : index
    %6 = vector.load %arg4[%c0_3, %c0_4] : memref<8x128xbf16, #tpu.memory_space<vmem>>, vector<8x128xbf16>
    %cst = arith.constant dense<0.000000e+00> : vector<128x128xf32>
    %7 = tpu.matmul %5, %6, %cst {dimension_numbers = #tpu.dot_dimension_numbers<[1], [0], [0], [1], [0, 0, 1, 1], [], []>} : vector<128x8xbf16>, vector<8x128xbf16>, vector<128x128xf32> -> vector<128x128xf32>
    %8 = arith.truncf %7 : vector<128x128xf32> to vector<128x128xbf16>
    %c0_5 = arith.constant 0 : index
    %c0_6 = arith.constant 0 : index
    %c0_7 = arith.constant 0 : index
    %9 = vector.load %arg7[%c0_5, %c0_6, %c0_7] : memref<1x128x128xbf16, #tpu.memory_space<vmem>>, vector<1x128x128xbf16>
    %10 = vector.shape_cast %9 : vector<1x128x128xbf16> to vector<128x128xbf16>
    %11 = vector.shape_cast %8 : vector<128x128xbf16> to vector<1x128x128xbf16>
    tpu.vector_store %arg7[%c0_5, %c0_6, %c0_7], %11 {strides = array<i32>} : memref<1x128x128xbf16, #tpu.memory_space<vmem>>, vector<1x128x128xbf16>,
    %cst_8 = arith.constant dense<0.000000e+00> : vector<128xf32>
    %12 = vector.multi_reduction <add>, %7, %cst_8 [0] : vector<128x128xf32> to vector<128xf32>
    %13 = vector.shape_cast %12 : vector<128xf32> to vector<1x128xf32>
    %14 = arith.mulf %7, %7 : vector<128x128xf32>
    %cst_9 = arith.constant dense<0.000000e+00> : vector<128xf32>
    %15 = vector.multi_reduction <add>, %14, %cst_9 [0] : vector<128x128xf32> to vector<128xf32>
    %16 = vector.shape_cast %15 : vector<128xf32> to vector<1x128xf32>
    %17 = tpu.concatenate %13, %16 in 0 : vector<1x128xf32>, vector<1x128xf32> -> vector<2x128xf32>
    %c0_10 = arith.constant 0 : index
    %c0_11 = arith.constant 0 : index
    %c0_12 = arith.constant 0 : index
    %18 = vector.load %arg8[%c0_10, %c0_11, %c0_12] : memref<1x2x128xf32, #tpu.memory_space<vmem>>, vector<1x2x128xf32>
    %19 = vector.shape_cast %18 : vector<1x2x128xf32> to vector<2x128xf32>
    %20 = arith.addf %19, %17 : vector<2x128xf32>
    %c0_13 = arith.constant 0 : index
    %c0_14 = arith.constant 0 : index
    %c0_15 = arith.constant 0 : index
    %21 = vector.load %arg8[%c0_13, %c0_14, %c0_15] : memref<1x2x128xf32, #tpu.memory_space<vmem>>, vector<1x2x128xf32>
    %22 = vector.shape_cast %21 : vector<1x2x128xf32> to vector<2x128xf32>
    %23 = vector.shape_cast %20 : vector<2x128xf32> to vector<1x2x128xf32>
    tpu.vector_store %arg8[%c0_13, %c0_14, %c0_15], %23 {strides = array<i32>} : memref<1x2x128xf32, #tpu.memory_space<vmem>>, vector<1x2x128xf32>,
    return
  }
  func.func @transform_0(%arg0: i32, %arg1: i32, %arg2: i32) -> (i32, i32, i32) {
    %c3_i32 = arith.constant 3 : i32
    %0 = arith.muli %arg0, %c3_i32 : i32
    %1 = arith.addi %0, %arg2 : i32
    %c0_i32 = arith.constant 0 : i32
    %c0_i32_0 = arith.constant 0 : i32
    return %arg1, %1, %c0_i32 : i32, i32, i32
  }
  func.func @transform_1(%arg0: i32, %arg1: i32, %arg2: i32) -> (i32, i32) {
    %c0_i32 = arith.constant 0 : i32
    %c0_i32_0 = arith.constant 0 : i32
    %c0_i32_1 = arith.constant 0 : i32
    return %c0_i32, %c0_i32_0 : i32, i32
  }
  func.func @transform_2(%arg0: i32, %arg1: i32, %arg2: i32) -> (i32, i32) {
    %c0_i32 = arith.constant 0 : i32
    %c0_i32_0 = arith.constant 0 : i32
    %c0_i32_1 = arith.constant 0 : i32
    return %c0_i32, %c0_i32_0 : i32, i32
  }
  func.func @transform_3(%arg0: i32, %arg1: i32, %arg2: i32) -> (i32, i32) {
    %c0_i32 = arith.constant 0 : i32
    %c0_i32_0 = arith.constant 0 : i32
    %c0_i32_1 = arith.constant 0 : i32
    return %c0_i32, %c0_i32_0 : i32, i32
  }
  func.func @transform_4(%arg0: i32, %arg1: i32, %arg2: i32) -> (i32, i32, i32) {
    %c3_i32 = arith.constant 3 : i32
    %0 = arith.muli %arg0, %c3_i32 : i32
    %1 = arith.addi %0, %arg2 : i32
    %c0_i32 = arith.constant 0 : i32
    %c0_i32_0 = arith.constant 0 : i32
    return %arg1, %1, %c0_i32 : i32, i32, i32
  }
  func.func @transform_5(%arg0: i32, %arg1: i32, %arg2: i32) -> (i32, i32, i32) {
    %c2_i32 = arith.constant 2 : i32
    %0 = arith.muli %arg0, %c2_i32 : i32
    %1 = arith.addi %0, %arg1 : i32
    %c0_i32 = arith.constant 0 : i32
    %c0_i32_0 = arith.constant 0 : i32
    %c0_i32_1 = arith.constant 0 : i32
    return %1, %c0_i32, %c0_i32_0 : i32, i32, i32
  }
}

module attributes {stable_mosaic.version = 11 : i64} {
  func.func @_layer_pass_kernel(%arg0: i32, %arg1: i32, %arg2: i32, %arg3: memref<1x128x128xbf16, #tpu.memory_space<vmem>>, %arg4: memref<128x128xbf16, #tpu.memory_space<vmem>>, %arg5: memref<1x128xf32, #tpu.memory_space<vmem>>, %arg6: memref<1x128xf32, #tpu.memory_space<vmem>>, %arg7: memref<1x2x128xf32, #tpu.memory_space<vmem>>, %arg8: memref<1x2x128xf32, #tpu.memory_space<vmem>>) attributes {dimension_semantics = [#tpu.dimension_semantics<parallel>, #tpu.dimension_semantics<parallel>, #tpu.dimension_semantics<arbitrary>], iteration_bounds = array<i64: 1, 2, 3>, scalar_prefetch = 0 : i64, scratch_operands = 0 : i64, tpu.core_type = #tpu.core_type<tc>, window_params = [{transform_indices = @transform_0, window_bounds = array<i64: 1, 128, 128>}, {pipeline_mode = #tpu.pipeline_mode<synchronous>, transform_indices = @transform_1, window_bounds = array<i64: 128, 128>}, {pipeline_mode = #tpu.pipeline_mode<synchronous>, transform_indices = @transform_2, window_bounds = array<i64: 1, 128>}, {pipeline_mode = #tpu.pipeline_mode<synchronous>, transform_indices = @transform_3, window_bounds = array<i64: 1, 128>}, {transform_indices = @transform_4, window_bounds = array<i64: 1, 2, 128>}, {transform_indices = @transform_5, window_bounds = array<i64: 1, 2, 128>}]} {
    %c3_i32 = arith.constant 3 : i32
    %0 = arith.muli %arg0, %c3_i32 : i32
    %1 = arith.addi %0, %arg2 : i32
    %c0_i32 = arith.constant 0 : i32
    %2 = arith.cmpi eq, %arg2, %c0_i32 : i32
    %3 = arith.extui %2 : i1 to i32
    %c0_i32_0 = arith.constant 0 : i32
    %4 = arith.cmpi ne, %3, %c0_i32_0 : i32
    scf.if %4 {
      %cst = arith.constant 0.000000e+00 : f32
      %13 = vector.broadcast %cst : f32 to vector<1x2x128xf32>
      %c0 = arith.constant 0 : index
      %c0_3 = arith.constant 0 : index
      %c0_4 = arith.constant 0 : index
      %14 = vector.load %arg7[%c0, %c0_3, %c0_4] : memref<1x2x128xf32, #tpu.memory_space<vmem>>, vector<1x2x128xf32>
      tpu.vector_store %arg7[%c0, %c0_3, %c0_4], %13 {strides = array<i32>} : memref<1x2x128xf32, #tpu.memory_space<vmem>>, vector<1x2x128xf32>,
      %cst_5 = arith.constant 0xFF800000 : f32
      %15 = vector.broadcast %cst_5 : f32 to vector<1x2x128xf32>
      %c0_6 = arith.constant 0 : index
      %c0_7 = arith.constant 0 : index
      %c0_8 = arith.constant 0 : index
      %16 = vector.load %arg8[%c0_6, %c0_7, %c0_8] : memref<1x2x128xf32, #tpu.memory_space<vmem>>, vector<1x2x128xf32>
      tpu.vector_store %arg8[%c0_6, %c0_7, %c0_8], %15 {strides = array<i32>} : memref<1x2x128xf32, #tpu.memory_space<vmem>>, vector<1x2x128xf32>,
    } else {
    }
    %c1_i32 = arith.constant 1 : i32
    %5 = arith.addi %1, %c1_i32 : i32
    %c128_i32 = arith.constant 128 : i32
    %6 = arith.muli %5, %c128_i32 : i32
    %c300_i32 = arith.constant 300 : i32
    %7 = arith.cmpi sgt, %6, %c300_i32 : i32
    %true = arith.constant true
    %8 = arith.xori %7, %true : i1
    %9 = arith.extui %8 : i1 to i32
    %c0_i32_1 = arith.constant 0 : i32
    %10 = arith.cmpi ne, %9, %c0_i32_1 : i32
    scf.if %10 {
      %c0 = arith.constant 0 : index
      %c0_3 = arith.constant 0 : index
      %c0_4 = arith.constant 0 : index
      %13 = vector.load %arg3[%c0, %c0_3, %c0_4] : memref<1x128x128xbf16, #tpu.memory_space<vmem>>, vector<1x128x128xbf16>
      %14 = vector.shape_cast %13 : vector<1x128x128xbf16> to vector<128x128xbf16>
      %15 = arith.extf %14 : vector<128x128xbf16> to vector<128x128xf32>
      %c0_5 = arith.constant 0 : index
      %c0_6 = arith.constant 0 : index
      %16 = vector.load %arg5[%c0_5, %c0_6] : memref<1x128xf32, #tpu.memory_space<vmem>>, vector<1x128xf32>
      %17 = vector.broadcast %16 : vector<1x128xf32> to vector<128x128xf32>
      %18 = arith.mulf %15, %17 : vector<128x128xf32>
      %c0_7 = arith.constant 0 : index
      %c0_8 = arith.constant 0 : index
      %19 = vector.load %arg6[%c0_7, %c0_8] : memref<1x128xf32, #tpu.memory_space<vmem>>, vector<1x128xf32>
      %20 = vector.broadcast %19 : vector<1x128xf32> to vector<128x128xf32>
      %21 = arith.addf %18, %20 : vector<128x128xf32>
      %cst = arith.constant 0.000000e+00 : f32
      %22 = vector.broadcast %cst : f32 to vector<128x128xf32>
      %23 = arith.maximumf %21, %22 : vector<128x128xf32>
      %24 = arith.truncf %23 : vector<128x128xf32> to vector<128x128xbf16>
      %c0_9 = arith.constant 0 : index
      %c0_10 = arith.constant 0 : index
      %25 = vector.load %arg4[%c0_9, %c0_10] : memref<128x128xbf16, #tpu.memory_space<vmem>>, vector<128x128xbf16>
      %cst_11 = arith.constant dense<0.000000e+00> : vector<128x128xf32>
      %26 = tpu.matmul %24, %25, %cst_11 {dimension_numbers = #tpu.dot_dimension_numbers<[1], [0], [0], [1], [0, 0, 1, 1], [], []>} : vector<128x128xbf16>, vector<128x128xbf16>, vector<128x128xf32> -> vector<128x128xf32>
      %cst_12 = arith.constant dense<0.000000e+00> : vector<128xf32>
      %27 = vector.multi_reduction <add>, %26, %cst_12 [0] : vector<128x128xf32> to vector<128xf32>
      %28 = vector.shape_cast %27 : vector<128xf32> to vector<1x128xf32>
      %29 = arith.mulf %26, %26 : vector<128x128xf32>
      %cst_13 = arith.constant dense<0.000000e+00> : vector<128xf32>
      %30 = vector.multi_reduction <add>, %29, %cst_13 [0] : vector<128x128xf32> to vector<128xf32>
      %31 = vector.shape_cast %30 : vector<128xf32> to vector<1x128xf32>
      %32 = tpu.concatenate %28, %31 in 0 : vector<1x128xf32>, vector<1x128xf32> -> vector<2x128xf32>
      %c0_14 = arith.constant 0 : index
      %c0_15 = arith.constant 0 : index
      %c0_16 = arith.constant 0 : index
      %33 = vector.load %arg7[%c0_14, %c0_15, %c0_16] : memref<1x2x128xf32, #tpu.memory_space<vmem>>, vector<1x2x128xf32>
      %34 = vector.shape_cast %33 : vector<1x2x128xf32> to vector<2x128xf32>
      %35 = arith.addf %34, %32 : vector<2x128xf32>
      %c0_17 = arith.constant 0 : index
      %c0_18 = arith.constant 0 : index
      %c0_19 = arith.constant 0 : index
      %36 = vector.load %arg7[%c0_17, %c0_18, %c0_19] : memref<1x2x128xf32, #tpu.memory_space<vmem>>, vector<1x2x128xf32>
      %37 = vector.shape_cast %36 : vector<1x2x128xf32> to vector<2x128xf32>
      %38 = vector.shape_cast %35 : vector<2x128xf32> to vector<1x2x128xf32>
      tpu.vector_store %arg7[%c0_17, %c0_18, %c0_19], %38 {strides = array<i32>} : memref<1x2x128xf32, #tpu.memory_space<vmem>>, vector<1x2x128xf32>,
      %cst_20 = arith.constant 0.000000e+00 : f32
      %39 = vector.broadcast %cst_20 : f32 to vector<128x128xf32>
      %40 = arith.subf %39, %26 : vector<128x128xf32>
      %cst_21 = arith.constant dense<0xFF800000> : vector<128xf32>
      %41 = vector.multi_reduction <maximumf>, %26, %cst_21 [0] : vector<128x128xf32> to vector<128xf32>
      %42 = vector.shape_cast %41 : vector<128xf32> to vector<1x128xf32>
      %cst_22 = arith.constant dense<0xFF800000> : vector<128xf32>
      %43 = vector.multi_reduction <maximumf>, %40, %cst_22 [0] : vector<128x128xf32> to vector<128xf32>
      %44 = vector.shape_cast %43 : vector<128xf32> to vector<1x128xf32>
      %45 = tpu.concatenate %42, %44 in 0 : vector<1x128xf32>, vector<1x128xf32> -> vector<2x128xf32>
      %c0_23 = arith.constant 0 : index
      %c0_24 = arith.constant 0 : index
      %c0_25 = arith.constant 0 : index
      %46 = vector.load %arg8[%c0_23, %c0_24, %c0_25] : memref<1x2x128xf32, #tpu.memory_space<vmem>>, vector<1x2x128xf32>
      %47 = vector.shape_cast %46 : vector<1x2x128xf32> to vector<2x128xf32>
      %48 = arith.maximumf %47, %45 : vector<2x128xf32>
      %c0_26 = arith.constant 0 : index
      %c0_27 = arith.constant 0 : index
      %c0_28 = arith.constant 0 : index
      %49 = vector.load %arg8[%c0_26, %c0_27, %c0_28] : memref<1x2x128xf32, #tpu.memory_space<vmem>>, vector<1x2x128xf32>
      %50 = vector.shape_cast %49 : vector<1x2x128xf32> to vector<2x128xf32>
      %51 = vector.shape_cast %48 : vector<2x128xf32> to vector<1x2x128xf32>
      tpu.vector_store %arg8[%c0_26, %c0_27, %c0_28], %51 {strides = array<i32>} : memref<1x2x128xf32, #tpu.memory_space<vmem>>, vector<1x2x128xf32>,
    } else {
    }
    %11 = arith.extui %7 : i1 to i32
    %c0_i32_2 = arith.constant 0 : i32
    %12 = arith.cmpi ne, %11, %c0_i32_2 : i32
    scf.if %12 {
      %c0 = arith.constant 0 : index
      %c0_3 = arith.constant 0 : index
      %c0_4 = arith.constant 0 : index
      %13 = vector.load %arg3[%c0, %c0_3, %c0_4] : memref<1x128x128xbf16, #tpu.memory_space<vmem>>, vector<1x128x128xbf16>
      %14 = vector.shape_cast %13 : vector<1x128x128xbf16> to vector<128x128xbf16>
      %15 = arith.extf %14 : vector<128x128xbf16> to vector<128x128xf32>
      %c0_5 = arith.constant 0 : index
      %c0_6 = arith.constant 0 : index
      %16 = vector.load %arg5[%c0_5, %c0_6] : memref<1x128xf32, #tpu.memory_space<vmem>>, vector<1x128xf32>
      %17 = vector.broadcast %16 : vector<1x128xf32> to vector<128x128xf32>
      %18 = arith.mulf %15, %17 : vector<128x128xf32>
      %c0_7 = arith.constant 0 : index
      %c0_8 = arith.constant 0 : index
      %19 = vector.load %arg6[%c0_7, %c0_8] : memref<1x128xf32, #tpu.memory_space<vmem>>, vector<1x128xf32>
      %20 = vector.broadcast %19 : vector<1x128xf32> to vector<128x128xf32>
      %21 = arith.addf %18, %20 : vector<128x128xf32>
      %cst = arith.constant 0.000000e+00 : f32
      %22 = vector.broadcast %cst : f32 to vector<128x128xf32>
      %23 = arith.maximumf %21, %22 : vector<128x128xf32>
      %24 = tpu.iota {dimensions = array<i32: 0>} : vector<128x1xi32>
      %c128_i32_9 = arith.constant 128 : i32
      %25 = arith.muli %1, %c128_i32_9 : i32
      %26 = vector.broadcast %25 : i32 to vector<128x1xi32>
      %27 = arith.addi %24, %26 : vector<128x1xi32>
      %c300_i32_10 = arith.constant 300 : i32
      %28 = vector.broadcast %c300_i32_10 : i32 to vector<128x1xi32>
      %29 = arith.cmpi slt, %27, %28 : vector<128x1xi32>
      %cst_11 = arith.constant 0.000000e+00 : f32
      %30 = vector.shape_cast %29 : vector<128x1xi1> to vector<128x1xi1>
      %31 = vector.broadcast %30 : vector<128x1xi1> to vector<128x128xi1>
      %32 = vector.broadcast %cst_11 : f32 to vector<128x128xf32>
      %33 = arith.select %31, %23, %32 : vector<128x128xi1>, vector<128x128xf32>
      %34 = arith.truncf %33 : vector<128x128xf32> to vector<128x128xbf16>
      %c0_12 = arith.constant 0 : index
      %c0_13 = arith.constant 0 : index
      %35 = vector.load %arg4[%c0_12, %c0_13] : memref<128x128xbf16, #tpu.memory_space<vmem>>, vector<128x128xbf16>
      %cst_14 = arith.constant dense<0.000000e+00> : vector<128x128xf32>
      %36 = tpu.matmul %34, %35, %cst_14 {dimension_numbers = #tpu.dot_dimension_numbers<[1], [0], [0], [1], [0, 0, 1, 1], [], []>} : vector<128x128xbf16>, vector<128x128xbf16>, vector<128x128xf32> -> vector<128x128xf32>
      %cst_15 = arith.constant dense<0.000000e+00> : vector<128xf32>
      %37 = vector.multi_reduction <add>, %36, %cst_15 [0] : vector<128x128xf32> to vector<128xf32>
      %38 = vector.shape_cast %37 : vector<128xf32> to vector<1x128xf32>
      %39 = arith.mulf %36, %36 : vector<128x128xf32>
      %cst_16 = arith.constant dense<0.000000e+00> : vector<128xf32>
      %40 = vector.multi_reduction <add>, %39, %cst_16 [0] : vector<128x128xf32> to vector<128xf32>
      %41 = vector.shape_cast %40 : vector<128xf32> to vector<1x128xf32>
      %42 = tpu.concatenate %38, %41 in 0 : vector<1x128xf32>, vector<1x128xf32> -> vector<2x128xf32>
      %c0_17 = arith.constant 0 : index
      %c0_18 = arith.constant 0 : index
      %c0_19 = arith.constant 0 : index
      %43 = vector.load %arg7[%c0_17, %c0_18, %c0_19] : memref<1x2x128xf32, #tpu.memory_space<vmem>>, vector<1x2x128xf32>
      %44 = vector.shape_cast %43 : vector<1x2x128xf32> to vector<2x128xf32>
      %45 = arith.addf %44, %42 : vector<2x128xf32>
      %c0_20 = arith.constant 0 : index
      %c0_21 = arith.constant 0 : index
      %c0_22 = arith.constant 0 : index
      %46 = vector.load %arg7[%c0_20, %c0_21, %c0_22] : memref<1x2x128xf32, #tpu.memory_space<vmem>>, vector<1x2x128xf32>
      %47 = vector.shape_cast %46 : vector<1x2x128xf32> to vector<2x128xf32>
      %48 = vector.shape_cast %45 : vector<2x128xf32> to vector<1x2x128xf32>
      tpu.vector_store %arg7[%c0_20, %c0_21, %c0_22], %48 {strides = array<i32>} : memref<1x2x128xf32, #tpu.memory_space<vmem>>, vector<1x2x128xf32>,
      %cst_23 = arith.constant 0xFF800000 : f32
      %49 = vector.shape_cast %29 : vector<128x1xi1> to vector<128x1xi1>
      %50 = vector.broadcast %49 : vector<128x1xi1> to vector<128x128xi1>
      %51 = vector.broadcast %cst_23 : f32 to vector<128x128xf32>
      %52 = arith.select %50, %36, %51 : vector<128x128xi1>, vector<128x128xf32>
      %cst_24 = arith.constant 0.000000e+00 : f32
      %53 = vector.broadcast %cst_24 : f32 to vector<128x128xf32>
      %54 = arith.subf %53, %36 : vector<128x128xf32>
      %cst_25 = arith.constant 0xFF800000 : f32
      %55 = vector.shape_cast %29 : vector<128x1xi1> to vector<128x1xi1>
      %56 = vector.broadcast %55 : vector<128x1xi1> to vector<128x128xi1>
      %57 = vector.broadcast %cst_25 : f32 to vector<128x128xf32>
      %58 = arith.select %56, %54, %57 : vector<128x128xi1>, vector<128x128xf32>
      %cst_26 = arith.constant dense<0xFF800000> : vector<128xf32>
      %59 = vector.multi_reduction <maximumf>, %52, %cst_26 [0] : vector<128x128xf32> to vector<128xf32>
      %60 = vector.shape_cast %59 : vector<128xf32> to vector<1x128xf32>
      %cst_27 = arith.constant dense<0xFF800000> : vector<128xf32>
      %61 = vector.multi_reduction <maximumf>, %58, %cst_27 [0] : vector<128x128xf32> to vector<128xf32>
      %62 = vector.shape_cast %61 : vector<128xf32> to vector<1x128xf32>
      %63 = tpu.concatenate %60, %62 in 0 : vector<1x128xf32>, vector<1x128xf32> -> vector<2x128xf32>
      %c0_28 = arith.constant 0 : index
      %c0_29 = arith.constant 0 : index
      %c0_30 = arith.constant 0 : index
      %64 = vector.load %arg8[%c0_28, %c0_29, %c0_30] : memref<1x2x128xf32, #tpu.memory_space<vmem>>, vector<1x2x128xf32>
      %65 = vector.shape_cast %64 : vector<1x2x128xf32> to vector<2x128xf32>
      %66 = arith.maximumf %65, %63 : vector<2x128xf32>
      %c0_31 = arith.constant 0 : index
      %c0_32 = arith.constant 0 : index
      %c0_33 = arith.constant 0 : index
      %67 = vector.load %arg8[%c0_31, %c0_32, %c0_33] : memref<1x2x128xf32, #tpu.memory_space<vmem>>, vector<1x2x128xf32>
      %68 = vector.shape_cast %67 : vector<1x2x128xf32> to vector<2x128xf32>
      %69 = vector.shape_cast %66 : vector<2x128xf32> to vector<1x2x128xf32>
      tpu.vector_store %arg8[%c0_31, %c0_32, %c0_33], %69 {strides = array<i32>} : memref<1x2x128xf32, #tpu.memory_space<vmem>>, vector<1x2x128xf32>,
    } else {
    }
    return
  }
  func.func @transform_0(%arg0: i32, %arg1: i32, %arg2: i32) -> (i32, i32, i32) {
    %c3_i32 = arith.constant 3 : i32
    %0 = arith.muli %arg0, %c3_i32 : i32
    %1 = arith.addi %0, %arg2 : i32
    %c0_i32 = arith.constant 0 : i32
    %c0_i32_0 = arith.constant 0 : i32
    return %arg1, %1, %c0_i32 : i32, i32, i32
  }
  func.func @transform_1(%arg0: i32, %arg1: i32, %arg2: i32) -> (i32, i32) {
    %c0_i32 = arith.constant 0 : i32
    %c0_i32_0 = arith.constant 0 : i32
    %c0_i32_1 = arith.constant 0 : i32
    return %c0_i32, %c0_i32_0 : i32, i32
  }
  func.func @transform_2(%arg0: i32, %arg1: i32, %arg2: i32) -> (i32, i32) {
    %c0_i32 = arith.constant 0 : i32
    %c0_i32_0 = arith.constant 0 : i32
    %c0_i32_1 = arith.constant 0 : i32
    return %c0_i32, %c0_i32_0 : i32, i32
  }
  func.func @transform_3(%arg0: i32, %arg1: i32, %arg2: i32) -> (i32, i32) {
    %c0_i32 = arith.constant 0 : i32
    %c0_i32_0 = arith.constant 0 : i32
    %c0_i32_1 = arith.constant 0 : i32
    return %c0_i32, %c0_i32_0 : i32, i32
  }
  func.func @transform_4(%arg0: i32, %arg1: i32, %arg2: i32) -> (i32, i32, i32) {
    %c2_i32 = arith.constant 2 : i32
    %0 = arith.muli %arg0, %c2_i32 : i32
    %1 = arith.addi %0, %arg1 : i32
    %c0_i32 = arith.constant 0 : i32
    %c0_i32_0 = arith.constant 0 : i32
    %c0_i32_1 = arith.constant 0 : i32
    return %1, %c0_i32, %c0_i32_0 : i32, i32, i32
  }
  func.func @transform_5(%arg0: i32, %arg1: i32, %arg2: i32) -> (i32, i32, i32) {
    %c2_i32 = arith.constant 2 : i32
    %0 = arith.muli %arg0, %c2_i32 : i32
    %1 = arith.addi %0, %arg1 : i32
    %c0_i32 = arith.constant 0 : i32
    %c0_i32_0 = arith.constant 0 : i32
    %c0_i32_1 = arith.constant 0 : i32
    return %1, %c0_i32, %c0_i32_0 : i32, i32, i32
  }
}

</mosaic_0001>

<bundles_post_ra>
// kernel: pointnet_set_abstraction_group_all.2
= control target key start
LH: loop header
LB: loop body
LE: loop exit
PB: predicated region body
PF: predicated region fallthrough
CT: control target
= control target key end

     0   :  { %s996_s18 = smov 0   ;;  %s998_s19 = smov 0   ;;  %s1098_s0 = inlined_call_operand.vmem [shape: f32[2,384,8], index: 0, kind: input, shape index: {}]   ;;  %s1099_s1 = inlined_call_operand.vmem [shape: bf16[8,128], index: 1, kind: input, shape index: {}]   ;;  %s1100_s2 = inlined_call_operand.vmem [shape: f32[1,8], index: 2, kind: input, shape index: {}]   ;;  %s1101_s3 = inlined_call_operand.vmem [shape: f32[1,8], index: 3, kind: input, shape index: {}]   ;;  %s1102_s4 = inlined_call_operand.vmem [shape: bf16[2,384,128], index: 4, kind: output, shape index: {0}]   ;;  %s1103_s5 = inlined_call_operand.vmem [shape: f32[2,2,128], index: 5, kind: output, shape index: {1}]  }
   0x1   :  { %s1000_s20 = smov 0   ;;  %s1002_s21 = smov 0  }
   0x2   :  { %s1004_s22 = smov 0  }
   0x3 LB: > { %s28_s2 = sadd.s32 1, %s955_s20  ;;  %s31_s3 = sadd.s32 1, %s959_s21  ;;  %s963_s22 = sphi %s1004_s22, %s16_s22   ;;  %s959_s21 = sphi %s1002_s21, %s1107_s21   ;;  %s955_s20 = sphi %s1000_s20, %s1106_s20   ;;  %s951_s19 = sphi %s998_s19, %s1105_s19   ;;  %s947_s18 = sphi %s996_s18, %s1104_s18  }
   0x4   : > { %p29_p0 = scmp.ge.s32.totalorder %s28_s2, 3  ;;  %p756_p1 = scmp.ge.s32.totalorder %s963_s22, 1 }
   0x5   : > { %p234_p2 = scmp.lt.s32.totalorder %s963_s22, 7 }
   0x6   : > { %s1109_s2 = smov (%p29_p0, %s28_s2), 0  ;;  %s1111_s3 = smov (!%p29_p0, %s31_s3), %s959_s21 }
   0x7   : > { %p235_p3 = pnand %p756_p1, %p234_p2  ;;  %p33_p4 = scmp.ge.s32.totalorder %s1111_s3, 2 }
   0x8   : > { %s757_s23 = sshll.u32 (!%p235_p3), %s947_s18, 4  ;;  %p283_p5 = scmp.lt.s32.totalorder (!%p235_p3), %s951_s19, 1 }
   0x9   : > { %s1113_s3 = smov (%p33_p4, %s1111_s3), 0  ;;  %238 = sbr.rel (%p235_p3) target bundleno = 293 (0x125), region = 36 }
   0xa   : > { %p285_p6 = scmp.lt.s32.totalorder (!%p235_p3), %s757_s23, 47  ;;  %p762_p7 = scmp.ne.s32.totalorder (!%p235_p3), %s947_s18, 0 }
  0x10   : > { %s1115_s19 = smov (!%p283_p5, %s951_s19), 1  ;;  %s1117_s23 = smov (!%p285_p6, %s757_s23), 47 }
  0x11   : > { %s883_s24 = smul.u32 48, %s1115_s19  ;;  %s761_s25 = sshll.u32 %s1115_s19, 1  ;;  %v965_v0 = vmov (!%p762_p7), 0.0  }
  0x12   : > { %s1032_s28 = scalar_lea.vmem %s1103_s5, %s761_s25  ;;  %320 = sbr.rel (%p762_p7) target bundleno = 25 (0x19), region = 40 }
  0x13   : > { %s288_s29 = sadd.s32 %s883_s24, %s1117_s23  ;;  %321 = vst [vmem:[%s1032_s28] sm:$0x3] (!%p762_p7), %v965_v0 }
  0x14   : > { %s758_s30 = sshll.u32 %s288_s29, 3  ;;  %s760_s6 = sshll.u32 %s288_s29, 2 }
  0x15   : > { %s1037_s9 = scalar_lea.vmem %s1098_s0, %s758_s30  ;;  %s1042_s12 = scalar_lea.vmem %s1102_s4, %s760_s6 }
  0x19 PF: > { %v346_v1 = vld [vmem:[%s1099_s1] sm:$0xf]  ;;  %vm372_vm0 = vcmask 1043456   ;;  %v323_v3 = vld [vmem:[%s1037_s9 + $0x8] sm:$0xff]  ;;  %vm347_vm1 = vcmask 64512   ;;  %v324_v6 = vld [vmem:[%s1037_s9 + $0x10] sm:$0xff] }
  0x1a   : > { %v322_v2 = vld [vmem:[%s1037_s9] sm:$0xff]  ;;  %881 = vmatprep.subr.msk.bf16.mxu0 %vm372_vm0, %v346_v1  ;;  %v374_v4 = vsel %vm372_vm0, %v346_v1, 0  ;;  %v325_v7 = vld [vmem:[%s1037_s9 + $0x18] sm:$0xff]  ;;  %882 = vmatprep.subr.msk.bf16.mxu1 %vm372_vm0, %v346_v1  ;;  %v327_v10 = vld [vmem:[%s1037_s9 + $0x28] sm:$0xff]  ;;  %vm611_vm2 = vcmask 1040384  }
  0x1b   : > { %v338_v5 = vpack.c.bf16 %v323_v3, %v322_v2  ;;  %v326_v8 = vld [vmem:[%s1037_s9 + $0x20] sm:$0xff]  ;;  %862 = vmatpush3.bf16.msra.mxu0 %v374_v4  ;;  %v339_v9 = vpack.c.bf16 %v325_v7, %v324_v6  ;;  %880 = vmatpush3.bf16.msra.mxu1 %v374_v4  ;;  %v331_v13 = vld [vmem:[%s1037_s9 + $0x48] sm:$0xff]  ;;  %v332_v14 = vld [vmem:[%s1037_s9 + $0x50] sm:$0xff] }
  0x1c   : > { %v340_v11 = vpack.c.bf16 %v327_v10, %v326_v8  ;;  %v330_v12 = vld [vmem:[%s1037_s9 + $0x40] sm:$0xff]  ;;  %v333_v16 = vld [vmem:[%s1037_s9 + $0x58] sm:$0xff]  ;;  %v335_v18 = vld [vmem:[%s1037_s9 + $0x68] sm:$0xff] }
  0x1d   : > { %863 = vmatprep.mubr.msk.bf16.mxu0 %vm347_vm1, %v338_v5  ;;  %v342_v15 = vpack.c.bf16 %v331_v13, %v330_v12  ;;  %v334_v17 = vld [vmem:[%s1037_s9 + $0x60] sm:$0xff]  ;;  %v343_v19 = vpack.c.bf16 %v333_v16, %v332_v14  ;;  %v328_v21 = vld [vmem:[%s1037_s9 + $0x30] sm:$0xff]  ;;  %v329_v22 = vld [vmem:[%s1037_s9 + $0x38] sm:$0xff] }
  0x1e   : > { %864 = vmatmul.mubr.msk.bf16.vlgmr.msra.gmra.mrb[0].mxu0 %vm347_vm1, %v339_v9  ;;  %v344_v20 = vpack.c.bf16 %v335_v18, %v334_v17  ;;  %v336_v23 = vld [vmem:[%s1037_s9 + $0x70] sm:$0xff]  ;;  %v337_v24 = vld [vmem:[%s1037_s9 + $0x78] sm:$0xff]  ;;  %v341_v25 = vpack.c.bf16 %v329_v22, %v328_v21 }
  0x1f   : > { %867 = vmatprep.mubr.msk.bf16.mxu0 %vm347_vm1, %v340_v11  ;;  %871 = vmatprep.mubr.msk.bf16.mxu1 %vm347_vm1, %v342_v15  ;;  %v345_v26 = vpack.c.bf16 %v337_v24, %v336_v23 }
  0x20   : > { %872 = vmatmul.mubr.msk.bf16.vlgmr.msra.gmra.mrb[0].mxu1 %vm347_vm1, %v343_v19 }
  0x21   : > { %875 = vmatprep.mubr.msk.bf16.mxu1 %vm347_vm1, %v344_v20 }
  0x26   : > { %868 = vmatmul.mubr.msk.bf16.gmra.mrb[4].mxu0 %vm347_vm1, %v341_v25 }
  0x28   : > { %876 = vmatmul.mubr.msk.bf16.gmra.mrb[4].mxu1 %vm347_vm1, %v345_v26 }
  0xf1   : > { %v865_v27 = vpop.f32.mrb[0].mxu0 }
  0xf2   : > { %v410_v28 = vpop.f32.mrb[1].mxu0  ;;  %v576_v41 = vmul.f32 %v865_v27, %v865_v27 }
  0xf3   : > { %v866_v29 = vpop.f32.mrb[2].mxu0  ;;  %v873_v30 = vpop.f32.mrb[0].mxu1  ;;  %v574_v34 = vmul.f32 %v410_v28, %v410_v28 }
  0xf4   : > { %v813_v31 = vpack.c.bf16 %v866_v29, %v865_v27  ;;  %v413_v32 = vpop.f32.mrb[3].mxu0  ;;  %v442_v33 = vpop.f32.mrb[1].mxu1  ;;  %v577_v45 = vmul.f32 %v866_v29, %v866_v29  ;;  %v584_v14 = vmul.f32 %v873_v30, %v873_v30 }
  0xf5   : > { %v808_v35 = vpack.c.bf16 %v413_v32, %v410_v28  ;;  %v553_v36 = vadd.f32 %v413_v32, %v410_v28  ;;  %v575_v37 = vmul.f32 %v413_v32, %v413_v32  ;;  %v874_v38 = vpop.f32.mrb[2].mxu1  ;;  %v582_v8 = vmul.f32 %v442_v33, %v442_v33 }
  0xf6   : > { %845 = vst [vmem:[%s1042_s12 + $0x8] sm:$0xff] %v813_v31   ;;  %v833_v39 = vpack.c.bf16 %v874_v38, %v873_v30  ;;  %v445_v40 = vpop.f32.mrb[3].mxu1  ;;  %v585_v17 = vmul.f32 %v874_v38, %v874_v38 }
  0xf7   : > { %809 = vst [vmem:[%s1042_s12] sm:$0xff] %v808_v35   ;;  %v554_v42 = vadd.f32 %v865_v27, %v553_v36  ;;  %v590_v43 = vadd.f32 %v575_v37, %v574_v34  ;;  %v828_v44 = vpack.c.bf16 %v445_v40, %v442_v33  ;;  %v583_v13 = vmul.f32 %v445_v40, %v445_v40 }
  0xf8   : > { %849 = vst [vmem:[%s1042_s12 + $0x28] sm:$0xff] %v833_v39  }
  0xf9   : > { %v591_v46 = vadd.f32 %v590_v43, %v576_v41  ;;  %v869_v47 = vpop.f32.mrb[4].mxu0  ;;  %v555_v48 = vadd.f32 %v866_v29, %v554_v42  ;;  %848 = vst [vmem:[%s1042_s12 + $0x20] sm:$0xff] %v828_v44  }
  0xfa   : > { %v426_v49 = vpop.f32.mrb[5].mxu0  ;;  %v580_v1 = vmul.f32 %v869_v47, %v869_v47 }
  0xfb   : > { %v556_v50 = vadd.f32 %v555_v48, %v426_v49  ;;  %v578_v51 = vmul.f32 %v426_v49, %v426_v49  ;;  %v592_v52 = vadd.f32 %v591_v46, %v577_v45  ;;  %v870_v53 = vpop.f32.mrb[6].mxu0  ;;  %v877_v54 = vpop.f32.mrb[4].mxu1  ;;  %v613_v45 = vld [vmem:[%s1032_s28] sm:$0x3] }
  0xfc   : > { %v823_v55 = vpack.c.bf16 %v870_v53, %v869_v47  ;;  %v429_v56 = vpop.f32.mrb[7].mxu0  ;;  %v458_v57 = vpop.f32.mrb[5].mxu1  ;;  %v581_v5 = vmul.f32 %v870_v53, %v870_v53  ;;  %v588_v26 = vmul.f32 %v877_v54, %v877_v54 }
  0xfd   : > { %v593_v58 = vadd.f32 %v592_v52, %v578_v51  ;;  %v818_v59 = vpack.c.bf16 %v429_v56, %v426_v49  ;;  %v557_v60 = vadd.f32 %v556_v50, %v429_v56  ;;  %v579_v61 = vmul.f32 %v429_v56, %v429_v56  ;;  %v878_v62 = vpop.f32.mrb[6].mxu1 }
  0xfe   : > { %847 = vst [vmem:[%s1042_s12 + $0x18] sm:$0xff] %v823_v55   ;;  %v843_v63 = vpack.c.bf16 %v878_v62, %v877_v54  ;;  %v461_v0 = vpop.f32.mrb[7].mxu1  ;;  %v586_v20 = vmul.f32 %v458_v57, %v458_v57  ;;  %v589_v29 = vmul.f32 %v878_v62, %v878_v62 }
  0xff   : > { %846 = vst [vmem:[%s1042_s12 + $0x10] sm:$0xff] %v818_v59   ;;  %v558_v2 = vadd.f32 %v869_v47, %v557_v60  ;;  %v594_v3 = vadd.f32 %v593_v58, %v579_v61  ;;  %v838_v4 = vpack.c.bf16 %v461_v0, %v458_v57  ;;  %v587_v25 = vmul.f32 %v461_v0, %v461_v0 }
 0x100   : > { %851 = vst [vmem:[%s1042_s12 + $0x38] sm:$0xff] %v843_v63  }
 0x101   : > { %v595_v6 = vadd.f32 %v594_v3, %v580_v1  ;;  %v559_v7 = vadd.f32 %v870_v53, %v558_v2  ;;  %850 = vst [vmem:[%s1042_s12 + $0x30] sm:$0xff] %v838_v4  }
 0x103   : > { %v560_v9 = vadd.f32 %v559_v7, %v442_v33  ;;  %v596_v10 = vadd.f32 %v595_v6, %v581_v5 }
 0x105   : > { %v597_v11 = vadd.f32 %v596_v10, %v582_v8  ;;  %v561_v12 = vadd.f32 %v560_v9, %v445_v40 }
 0x107   : > { %v562_v15 = vadd.f32 %v873_v30, %v561_v12  ;;  %v598_v16 = vadd.f32 %v597_v11, %v583_v13 }
 0x109   : > { %v599_v18 = vadd.f32 %v598_v16, %v584_v14  ;;  %v563_v19 = vadd.f32 %v874_v38, %v562_v15 }
 0x10b   : > { %v564_v21 = vadd.f32 %v563_v19, %v458_v57  ;;  %v600_v22 = vadd.f32 %v599_v18, %v585_v17 }
 0x10d   : > { %v601_v23 = vadd.f32 %v600_v22, %v586_v20  ;;  %v565_v24 = vadd.f32 %v564_v21, %v461_v0 }
 0x10f   : > { %v566_v27 = vadd.f32 %v877_v54, %v565_v24  ;;  %v602_v28 = vadd.f32 %v601_v23, %v587_v25 }
 0x111   : > { %v567_v31 = vadd.f32 %v878_v62, %v566_v27  ;;  %v603_v32 = vadd.f32 %v602_v28, %v588_v26 }
 0x113   : > { %v568_v33 = vrot.slane %v567_v31, 4  ;;  %v604_v34 = vadd.f32 %v603_v32, %v589_v29 }
 0x115   : > { %v569_v30 = vadd.f32 %v568_v33, %v567_v31  ;;  %v605_v35 = vrot.slane %v604_v34, 4 }
 0x117   : > { %v570_v36 = vrot.slane %v569_v30, 2  ;;  %v606_v37 = vadd.f32 %v605_v35, %v604_v34 }
 0x119   : > { %v571_v38 = vadd.f32 %v570_v36, %v569_v30  ;;  %v607_v39 = vrot.slane %v606_v37, 2 }
 0x11b   : > { %v572_v40 = vrot.slane %v571_v38, 1  ;;  %v608_v41 = vadd.f32 %v607_v39, %v606_v37 }
 0x11d   : > { %v609_v42 = vrot.slane %v608_v41, 1  ;;  %v573_v43 = vadd.f32 %v572_v40, %v571_v38 }
 0x11f   : > { %v610_v44 = vadd.f32 %v609_v42, %v608_v41 }
 0x121   : > { %v612_v46 = vsel %vm611_vm2, %v573_v43, %v610_v44 }
 0x122   : > { %v614_v47 = vadd.f32 %v613_v45, %v612_v46 }
 0x124   : > { %615 = vst [vmem:[%s1032_s28] sm:$0x3] %v614_v47 }
 0x125 PF: > { %s16_s22 = sadd.s32 1, %s963_s22   ;;  %s1104_s18 = smov %s955_s20 }
 0x126   : > { %p13_p8 = scmp.ge.s32.totalorder %s16_s22, 8   ;;  %s1105_s19 = smov %s959_s21 }
 0x127   : > { %s1106_s20 = smov %s1109_s2  ;;  %s1107_s21 = smov %s1113_s3 }
 0x128   :  { %15 = sbr.rel (!%p13_p8) target bundleno = 3 (0x3), region = 82 }

// kernel: pointnet_set_abstraction_group_all.3
= control target key start
LH: loop header
LB: loop body
LE: loop exit
PB: predicated region body
PF: predicated region fallthrough
CT: control target
= control target key end

     0   :  { %s1745_s18 = smov 0   ;;  %s1747_s19 = smov 0   ;;  %s2310_s0 = inlined_call_operand.vmem [shape: bf16[2,384,128], index: 0, kind: input, shape index: {}]   ;;  %s2311_s1 = inlined_call_operand.vmem [shape: bf16[128,128], index: 1, kind: input, shape index: {}]   ;;  %s2312_s2 = inlined_call_operand.vmem [shape: f32[1,128], index: 2, kind: input, shape index: {}]   ;;  %s2313_s3 = inlined_call_operand.vmem [shape: f32[1,128], index: 3, kind: input, shape index: {}]   ;;  %s2314_s4 = inlined_call_operand.vmem [shape: f32[2,2,128], index: 4, kind: output, shape index: {0}]   ;;  %s2315_s5 = inlined_call_operand.vmem [shape: f32[2,2,128], index: 5, kind: output, shape index: {1}]  }
   0x1   :  { %s1749_s20 = smov 0   ;;  %s1751_s21 = smov 0  }
   0x2   :  { %s1753_s22 = smov 0  }
   0x3 LB: > { %s28_s23 = sadd.s32 1, %s1703_s20  ;;  %s31_s24 = sadd.s32 1, %s1707_s21  ;;  %s1711_s22 = sphi %s1753_s22, %s16_s22   ;;  %s1707_s21 = sphi %s1751_s21, %s2336_s21   ;;  %s1703_s20 = sphi %s1749_s20, %s2335_s20   ;;  %s1699_s19 = sphi %s1747_s19, %s2334_s19   ;;  %s1695_s18 = sphi %s1745_s18, %s2333_s18  }
   0x4   : > { %p29_p0 = scmp.ge.s32.totalorder %s28_s23, 3  ;;  %p1350_p1 = scmp.ge.s32.totalorder %s1711_s22, 1 }
   0x5   : > { %p232_p2 = scmp.lt.s32.totalorder %s1711_s22, 7 }
   0x6   : > { %s2338_s23 = smov (%p29_p0, %s28_s23), 0  ;;  %s2340_s24 = smov (!%p29_p0, %s31_s24), %s1707_s21 }
   0x7   : > { %p233_p3 = pnand %p1350_p1, %p232_p2  ;;  %p33_p4 = scmp.ge.s32.totalorder %s2340_s24, 2 }
   0x8   : > { %s1351_s25 = sshll.u32 (!%p233_p3), %s1695_s18, 4  ;;  %p276_p5 = scmp.lt.s32.totalorder (!%p233_p3), %s1699_s19, 1 }
   0x9   : > { %s2342_s24 = smov (%p33_p4, %s2340_s24), 0  ;;  %236 = sbr.rel (%p233_p3) target bundleno = 629 (0x275), region = 36 }
   0xa   : > { %p278_p6 = scmp.lt.s32.totalorder (!%p233_p3), %s1351_s25, 47  ;;  %p1355_p7 = scmp.ne.s32.totalorder (!%p233_p3), %s1695_s18, 0 }
  0x10   : > { %s2344_s19 = smov (!%p276_p5, %s1699_s19), 1  ;;  %s2346_s25 = smov (!%p278_p6, %s1351_s25), 47 }
  0x11   : > { %s1614_s26 = smul.u32 48, %s2344_s19  ;;  %s1353_s27 = sshll.u32 %s2344_s19, 1  ;;  %v1713_v0 = vmov (!%p1355_p7), 0.0   ;;  %v1714_v1 = vmov (!%p1355_p7), -inf  }
  0x12   : > { %s1781_s30 = scalar_lea.vmem %s2314_s4, %s1353_s27  ;;  %s1786_s8 = scalar_lea.vmem %s2315_s5, %s1353_s27 }
  0x13   : > { %s281_s9 = sadd.s32 %s1614_s26, %s2346_s25  ;;  %309 = sbr.rel (%p1355_p7) target bundleno = 26 (0x1a), region = 40  ;;  %310 = vst [vmem:[%s1781_s30] sm:$0x3] (!%p1355_p7), %v1713_v0  ;;  %311 = vst [vmem:[%s1786_s8] sm:$0x3] (!%p1355_p7), %v1714_v1 }
  0x14   : > { %s1352_s10 = sshll.u32 %s281_s9, 2 }
  0x15   : > { %s1791_s13 = scalar_lea.vmem %s2310_s0, %s1352_s10 }
  0x1a PF: > { %s1406_s14 = sshll.u32 %s1695_s18, 7 }
  0x1b   : > { %s1799_s15 = sadd.s32 128, %s1406_s14 }
  0x1c   : > { %p1357_p8 = scmp.gt.s32.totalorder %s1799_s15, 300 }
  0x1d   : > { %v1657_v2 = vld [vmem:[%s2311_s1] sm:$0xff] (!%p1357_p8)   ;;  %v1658_v3 = vld [vmem:[%s2311_s1 + $0x8] sm:$0xff] (!%p1357_p8)   ;;  %v1659_v4 = vld [vmem:[%s2311_s1 + $0x10] sm:$0xff] (!%p1357_p8)   ;;  %vm640_vm0 = vcmask (!%p1357_p8), 1040384  }
  0x1e   : > { %318 = sbr.rel (%p1357_p8) target bundleno = 328 (0x148), region = 44  ;;  %1518 = vmatprep.subr.bf16.mxu0 (!%p1357_p8), %v1657_v2  ;;  %1582 = vmatprep.subr.bf16.mxu1 (!%p1357_p8), %v1657_v2  ;;  %v1660_v5 = vld [vmem:[%s2311_s1 + $0x18] sm:$0xff] (!%p1357_p8)   ;;  %v1409_v6 = vld [vmem:[%s1791_s13] sm:$0xff] (!%p1357_p8)   ;;  %v1472_v10 = vld [vmem:[%s1791_s13 + $0x8] sm:$0xff] (!%p1357_p8)  }
  0x1f   : > { %1519 = vmatpush3.bf16.msra.mxu0 (!%p1357_p8), %v1657_v2  ;;  %1590 = vmatpush3.bf16.msra.mxu1 (!%p1357_p8), %v1657_v2  ;;  %v1818_v7 = vld [vmem:[%s2312_s2] ss:$0 sm:$0xff] (!%p1357_p8)  ;;  %v1410_v8 = vunpack.c.l.bf16 (!%p1357_p8), %v1409_v6  ;;  %v1411_v9 = vunpack.c.h.bf16 (!%p1357_p8), %v1409_v6  ;;  %v1476_v12 = vld [vmem:[%s1791_s13 + $0x28] sm:$0xff] (!%p1357_p8)   ;;  %v1414_v19 = vunpack.c.l.bf16 (!%p1357_p8), %v1472_v10  ;;  %v1415_v20 = vunpack.c.h.bf16 (!%p1357_p8), %v1472_v10  ;;  %v1473_v23 = vld [vmem:[%s1791_s13 + $0x10] sm:$0xff] (!%p1357_p8)  }
  0x20   : > { %1520 = vmatprep.subr.bf16.mxu0 (!%p1357_p8), %v1658_v3  ;;  %1583 = vmatprep.subr.bf16.mxu1 (!%p1357_p8), %v1658_v3  ;;  %v1475_v11 = vld [vmem:[%s1791_s13 + $0x20] sm:$0xff] (!%p1357_p8)   ;;  %v1430_v22 = vunpack.c.l.bf16 (!%p1357_p8), %v1476_v12  ;;  %v1431_v27 = vunpack.c.h.bf16 (!%p1357_p8), %v1476_v12  ;;  %v1418_v32 = vunpack.c.l.bf16 (!%p1357_p8), %v1473_v23  ;;  %v1662_v33 = vld [vmem:[%s2311_s1 + $0x28] sm:$0xff] (!%p1357_p8)   ;;  %v1477_v38 = vld [vmem:[%s1791_s13 + $0x30] sm:$0xff] (!%p1357_p8)   ;;  %v1419_v42 = vunpack.c.h.bf16 (!%p1357_p8), %v1473_v23 }
  0x21   : > { %v1826_v13 = vld [vmem:[%s2313_s3] ss:$0 sm:$0xff] (!%p1357_p8)  ;;  %v1426_v14 = vunpack.c.l.bf16 (!%p1357_p8), %v1475_v11  ;;  %v1427_v15 = vunpack.c.h.bf16 (!%p1357_p8), %v1475_v11  ;;  %v358_v16 = vmul.f32 (!%p1357_p8), %v1410_v8, %v1818_v7  ;;  %v359_v17 = vmul.f32 (!%p1357_p8), %v1411_v9, %v1818_v7  ;;  %v1474_v43 = vld [vmem:[%s1791_s13 + $0x18] sm:$0xff] (!%p1357_p8)   ;;  %v1663_v49 = vld [vmem:[%s2311_s1 + $0x30] sm:$0xff] (!%p1357_p8)  }
  0x22   : > { %v1661_v18 = vld [vmem:[%s2311_s1 + $0x20] sm:$0xff] (!%p1357_p8)   ;;  %v360_v34 = vmul.f32 (!%p1357_p8), %v1414_v19, %v1818_v7  ;;  %v361_v35 = vmul.f32 (!%p1357_p8), %v1415_v20, %v1818_v7  ;;  %v368_v37 = vmul.f32 (!%p1357_p8), %v1430_v22, %v1818_v7  ;;  %v369_v41 = vmul.f32 (!%p1357_p8), %v1431_v27, %v1818_v7  ;;  %v1478_v48 = vld [vmem:[%s1791_s13 + $0x38] sm:$0xff] (!%p1357_p8)  }
  0x23   : > { %1521 = vmatpush3.bf16.msra.mxu0 (!%p1357_p8), %v1658_v3  ;;  %1591 = vmatpush3.bf16.msra.mxu1 (!%p1357_p8), %v1658_v3  ;;  %v366_v21 = vmul.f32 (!%p1357_p8), %v1426_v14, %v1818_v7  ;;  %v381_v24 = vadd.f32 (!%p1357_p8), %v1826_v13, %v358_v16  ;;  %v382_v25 = vadd.f32 (!%p1357_p8), %v1826_v13, %v359_v17  ;;  %v1434_v47 = vunpack.c.l.bf16 (!%p1357_p8), %v1477_v38  ;;  %v1664_v0 = vld [vmem:[%s2311_s1 + $0x38] sm:$0xff] (!%p1357_p8)  }
  0x24   : > { %1522 = vmatprep.subr.bf16.mxu0 (!%p1357_p8), %v1659_v4  ;;  %1584 = vmatprep.subr.bf16.mxu1 (!%p1357_p8), %v1659_v4  ;;  %v367_v26 = vmul.f32 (!%p1357_p8), %v1427_v15, %v1818_v7  ;;  %v362_v45 = vmul.f32 (!%p1357_p8), %v1418_v32, %v1818_v7  ;;  %v363_v46 = vmul.f32 (!%p1357_p8), %v1419_v42, %v1818_v7  ;;  %v1435_v52 = vunpack.c.h.bf16 (!%p1357_p8), %v1477_v38 }
  0x25   : > { %v389_v28 = vadd.f32 %v1826_v13, %v366_v21  ;;  %v397_v29 = vmax.f32 %v381_v24, 0.0  ;;  %v398_v30 = vmax.f32 %v382_v25, 0.0  ;;  %v383_v50 = vadd.f32 %v1826_v13, %v360_v34 }
  0x26   : > { %v390_v31 = vadd.f32 %v1826_v13, %v367_v26  ;;  %v384_v51 = vadd.f32 %v1826_v13, %v361_v35  ;;  %v391_v53 = vadd.f32 %v1826_v13, %v368_v37  ;;  %v392_v54 = vadd.f32 %v1826_v13, %v369_v41 }
  0x27   : > { %1523 = vmatpush3.bf16.msra.mxu0 %v1659_v4  ;;  %1592 = vmatpush3.bf16.msra.mxu1 %v1659_v4  ;;  %v405_v36 = vmax.f32 %v389_v28, 0.0  ;;  %v413_v39 = vpack.c.bf16 %v398_v30, %v397_v29  ;;  %v1422_v55 = vunpack.c.l.bf16 %v1474_v43  ;;  %v370_v56 = vmul.f32 %v1434_v47, %v1818_v7 }
  0x28   : > { %1524 = vmatprep.subr.bf16.mxu0 %v1660_v5  ;;  %1585 = vmatprep.subr.bf16.mxu1 %v1660_v5  ;;  %v406_v40 = vmax.f32 %v390_v31, 0.0  ;;  %v1423_v57 = vunpack.c.h.bf16 %v1474_v43  ;;  %v371_v58 = vmul.f32 %v1435_v52, %v1818_v7  ;;  %v1438_v59 = vunpack.c.l.bf16 %v1478_v48 }
  0x29   : > { %1534 = vmatprep.mubr.bf16.mxu0 %v413_v39  ;;  %v1439_v60 = vunpack.c.h.bf16 %v1478_v48  ;;  %v385_v61 = vadd.f32 %v1826_v13, %v362_v45  ;;  %v386_v62 = vadd.f32 %v1826_v13, %v363_v46  ;;  %v393_v63 = vadd.f32 %v1826_v13, %v370_v56 }
  0x2a   : > { %v417_v44 = vpack.c.bf16 %v406_v40, %v405_v36  ;;  %v394_v1 = vadd.f32 %v1826_v13, %v371_v58  ;;  %v399_v2 = vmax.f32 %v383_v50, 0.0  ;;  %v400_v3 = vmax.f32 %v384_v51, 0.0 }
  0x2b   : > { %1525 = vmatpush3.bf16.msra.mxu0 %v1660_v5  ;;  %1593 = vmatpush3.bf16.msra.mxu1 %v1660_v5  ;;  %v407_v4 = vmax.f32 %v391_v53, 0.0  ;;  %v408_v5 = vmax.f32 %v392_v54, 0.0  ;;  %v364_v6 = vmul.f32 %v1422_v55, %v1818_v7  ;;  %v365_v8 = vmul.f32 %v1423_v57, %v1818_v7 }
  0x2c   : > { %1526 = vmatprep.subr.bf16.mxu0 %v1661_v18  ;;  %1586 = vmatprep.subr.bf16.mxu1 %v1661_v18  ;;  %v372_v9 = vmul.f32 %v1438_v59, %v1818_v7  ;;  %v373_v10 = vmul.f32 %v1439_v60, %v1818_v7  ;;  %v401_v11 = vmax.f32 %v385_v61, 0.0  ;;  %v402_v12 = vmax.f32 %v386_v62, 0.0 }
  0x2d   : > { %1542 = vmatprep.mubr.bf16.mxu1 %v417_v44  ;;  %v409_v14 = vmax.f32 %v393_v63, 0.0  ;;  %v410_v15 = vmax.f32 %v394_v1, 0.0  ;;  %v414_v16 = vpack.c.bf16 %v400_v3, %v399_v2  ;;  %v418_v17 = vpack.c.bf16 %v408_v5, %v407_v4 }
  0x2e   : > { %v388_v19 = vadd.f32 %v1826_v13, %v365_v8  ;;  %v395_v20 = vadd.f32 %v1826_v13, %v372_v9  ;;  %v396_v21 = vadd.f32 %v1826_v13, %v373_v10  ;;  %v415_v7 = vpack.c.bf16 %v402_v12, %v401_v11 }
  0x2f   : > { %1527 = vmatpush3.bf16.msra.mxu0 %v1661_v18  ;;  %1594 = vmatpush3.bf16.msra.mxu1 %v1661_v18  ;;  %v387_v18 = vadd.f32 %v1826_v13, %v364_v6  ;;  %v419_v22 = vpack.c.bf16 %v410_v15, %v409_v14 }
  0x30   : > { %1528 = vmatprep.subr.bf16.mxu0 %v1662_v33  ;;  %1587 = vmatprep.subr.bf16.mxu1 %v1662_v33  ;;  %v404_v24 = vmax.f32 %v388_v19, 0.0  ;;  %v411_v25 = vmax.f32 %v395_v20, 0.0  ;;  %v412_v26 = vmax.f32 %v396_v21, 0.0 }
  0x31   : > { %v403_v23 = vmax.f32 %v387_v18, 0.0 }
  0x32   : > { %v420_v28 = vpack.c.bf16 %v412_v26, %v411_v25 }
  0x33   : > { %1529 = vmatpush3.bf16.msra.mxu0 %v1662_v33  ;;  %1595 = vmatpush3.bf16.msra.mxu1 %v1662_v33  ;;  %v416_v27 = vpack.c.bf16 %v404_v24, %v403_v23 }
  0x34   : > { %1530 = vmatprep.subr.bf16.mxu0 %v1663_v49  ;;  %1588 = vmatprep.subr.bf16.mxu1 %v1663_v49 }
  0x37   : > { %1531 = vmatpush3.bf16.msra.mxu0 %v1663_v49  ;;  %1596 = vmatpush3.bf16.msra.mxu1 %v1663_v49 }
  0x38   : > { %1532 = vmatprep.subr.bf16.mxu0 %v1664_v0  ;;  %1589 = vmatprep.subr.bf16.mxu1 %v1664_v0 }
  0x3b   : > { %1533 = vmatpush3.bf16.msra.mxu0 %v1664_v0  ;;  %1597 = vmatpush3.bf16.msra.mxu1 %v1664_v0 }
  0x3e   : > { %1535 = vmatmul.mubr.bf16.vlgmr.msra.gmra.mrb[0].mxu0 %v414_v16  ;;  %1543 = vmatmul.mubr.bf16.vlgmr.msra.gmra.mrb[0].mxu1 %v418_v17 }
  0x3f   : > { %1538 = vmatprep.mubr.bf16.mxu0 %v415_v7  ;;  %1546 = vmatprep.mubr.bf16.mxu1 %v419_v22 }
  0x46   : > { %1539 = vmatmul.mubr.bf16.gmra.mrb[4].mxu0 %v416_v27  ;;  %1547 = vmatmul.mubr.bf16.gmra.mrb[4].mxu1 %v420_v28 }
 0x111   : > { %v1536_v29 = vpop.f32.mrb[0].mxu0  ;;  %v1876_v30 = vpop.f32.mrb[0].mxu1 }
 0x112   : > { %v519_v13 = vpop.f32.mrb[1].mxu0  ;;  %v1878_v31 = vpop.f32.mrb[1].mxu1  ;;  %v605_v39 = vmul.f32 %v1536_v29, %v1536_v29  ;;  %v647_v42 = vsub.f32 0.0, %v1536_v29  ;;  %v655_v44 = vsub.f32 0.0, %v1876_v30 }
 0x113   : > { %v1537_v32 = vpop.f32.mrb[2].mxu0  ;;  %v1880_v33 = vpop.f32.mrb[2].mxu1  ;;  %v603_v36 = vmul.f32 %v519_v13, %v519_v13  ;;  %v645_v43 = vsub.f32 0.0, %v519_v13  ;;  %v653_v45 = vsub.f32 0.0, %v1878_v31 }
 0x114   : > { %v1882_v34 = vpop.f32.mrb[3].mxu0  ;;  %v1884_v35 = vpop.f32.mrb[3].mxu1  ;;  %v606_v46 = vmul.f32 %v1537_v32, %v1537_v32  ;;  %v648_v47 = vsub.f32 0.0, %v1537_v32  ;;  %v656_v56 = vsub.f32 0.0, %v1880_v33 }
 0x115   : > { %v582_v37 = vadd.f32 %v1882_v34, %v519_v13  ;;  %v604_v38 = vmul.f32 %v1882_v34, %v1882_v34  ;;  %v646_v52 = vsub.f32 0.0, %v1882_v34  ;;  %v654_v62 = vsub.f32 0.0, %v1884_v35 }
 0x117   : > { %v583_v40 = vadd.f32 %v1536_v29, %v582_v37  ;;  %v619_v41 = vadd.f32 %v604_v38, %v603_v36 }
 0x119   : > { %v620_v48 = vadd.f32 %v619_v41, %v605_v39  ;;  %v1540_v49 = vpop.f32.mrb[4].mxu0  ;;  %v584_v50 = vadd.f32 %v1537_v32, %v583_v40  ;;  %v1891_v51 = vpop.f32.mrb[4].mxu1 }
 0x11a   : > { %v651_v53 = vsub.f32 0.0, %v1540_v49  ;;  %v663_v54 = vmax.f32 %v1536_v29, %v1540_v49  ;;  %v535_v55 = vpop.f32.mrb[5].mxu0  ;;  %v1895_v57 = vpop.f32.mrb[5].mxu1  ;;  %v659_v22 = vsub.f32 0.0, %v1891_v51  ;;  %v609_v23 = vmul.f32 %v1540_v49, %v1540_v49 }
 0x11b   : > { %v649_v58 = vsub.f32 0.0, %v535_v55  ;;  %v661_v59 = vmax.f32 %v519_v13, %v535_v55  ;;  %v1541_v60 = vpop.f32.mrb[6].mxu0  ;;  %v585_v61 = vadd.f32 %v584_v50, %v535_v55  ;;  %v1898_v63 = vpop.f32.mrb[6].mxu1  ;;  %v607_v2 = vmul.f32 %v535_v55, %v535_v55 }
 0x11c   : > { %v684_v0 = vmax.f32 %v647_v42, %v651_v53  ;;  %v667_v1 = vmax.f32 %v663_v54, %v1876_v30  ;;  %v652_v3 = vsub.f32 0.0, %v1541_v60  ;;  %v538_v4 = vpop.f32.mrb[7].mxu0  ;;  %v570_v5 = vpop.f32.mrb[7].mxu1  ;;  %v664_v9 = vmax.f32 %v1537_v32, %v1541_v60 }
 0x11d   : > { %v682_v6 = vmax.f32 %v645_v43, %v649_v58  ;;  %v665_v8 = vmax.f32 %v661_v59, %v1878_v31  ;;  %v586_v10 = vadd.f32 %v585_v61, %v538_v4  ;;  %v608_v14 = vmul.f32 %v538_v4, %v538_v4 }
 0x11e   : > { %v688_v11 = vmax.f32 %v684_v0, %v655_v44  ;;  %v685_v12 = vmax.f32 %v648_v47, %v652_v3  ;;  %v621_v15 = vadd.f32 %v620_v48, %v606_v46  ;;  %v668_v17 = vmax.f32 %v664_v9, %v1880_v33 }
 0x11f   : > { %v686_v16 = vmax.f32 %v682_v6, %v653_v45  ;;  %v587_v18 = vadd.f32 %v1540_v49, %v586_v10  ;;  %v650_v19 = vsub.f32 0.0, %v538_v4  ;;  %v662_v7 = vmax.f32 %v1882_v34, %v538_v4 }
 0x120   : > { %v689_v20 = vmax.f32 %v685_v12, %v656_v56  ;;  %v622_v21 = vadd.f32 %v621_v15, %v607_v2  ;;  %v671_v26 = vmax.f32 %v667_v1, %v1891_v51  ;;  %v692_v28 = vmax.f32 %v688_v11, %v659_v22 }
 0x121   : > { %v588_v24 = vadd.f32 %v1541_v60, %v587_v18  ;;  %v683_v25 = vmax.f32 %v646_v52, %v650_v19  ;;  %v657_v29 = vsub.f32 0.0, %v1895_v57  ;;  %v669_v13 = vmax.f32 %v665_v8, %v1895_v57 }
 0x122   : > { %v623_v27 = vadd.f32 %v622_v21, %v608_v14  ;;  %v611_v32 = vmul.f32 %v1878_v31, %v1878_v31  ;;  %v660_v34 = vsub.f32 0.0, %v1898_v63  ;;  %v672_v37 = vmax.f32 %v668_v17, %v1898_v63 }
 0x123   : > { %v589_v36 = vadd.f32 %v588_v24, %v1878_v31  ;;  %v610_v38 = vmul.f32 %v1541_v60, %v1541_v60  ;;  %v690_v40 = vmax.f32 %v686_v16, %v657_v29  ;;  %v658_v41 = vsub.f32 0.0, %v570_v5 }
 0x124   : > { %v624_v39 = vadd.f32 %v623_v27, %v609_v23  ;;  %v674_v43 = vmax.f32 %v671_v26, %v672_v37  ;;  %v693_v44 = vmax.f32 %v689_v20, %v660_v34  ;;  %v666_v45 = vmax.f32 %v662_v7, %v1884_v35  ;;  %v704_v26 = vld [vmem:[%s1786_s8] sm:$0x3] }
 0x125   : > { %v590_v42 = vadd.f32 %v589_v36, %v1884_v35  ;;  %v687_v47 = vmax.f32 %v683_v25, %v654_v62  ;;  %v612_v50 = vmul.f32 %v1884_v35, %v1884_v35  ;;  %v613_v56 = vmul.f32 %v1876_v30, %v1876_v30 }
 0x126   : > { %v625_v46 = vadd.f32 %v624_v39, %v610_v38  ;;  %v695_v49 = vmax.f32 %v692_v28, %v693_v44  ;;  %v670_v31 = vmax.f32 %v666_v45, %v570_v5  ;;  %v614_v62 = vmul.f32 %v1880_v33, %v1880_v33  ;;  %v642_v39 = vld [vmem:[%s1781_s30] sm:$0x3] }
 0x127   : > { %v591_v48 = vadd.f32 %v1876_v30, %v590_v42  ;;  %v691_v53 = vmax.f32 %v687_v47, %v658_v41  ;;  %v615_v35 = vmul.f32 %v1895_v57, %v1895_v57  ;;  %v616_v9 = vmul.f32 %v570_v5, %v570_v5 }
 0x128   : > { %v626_v52 = vadd.f32 %v625_v46, %v611_v32  ;;  %v673_v55 = vmax.f32 %v669_v13, %v670_v31  ;;  %v618_v18 = vmul.f32 %v1898_v63, %v1898_v63 }
 0x129   : > { %v592_v54 = vadd.f32 %v1880_v33, %v591_v48  ;;  %v694_v59 = vmax.f32 %v690_v40, %v691_v53  ;;  %v617_v33 = vmul.f32 %v1891_v51, %v1891_v51 }
 0x12a   : > { %v627_v58 = vadd.f32 %v626_v52, %v612_v50  ;;  %v675_v61 = vmax.f32 %v673_v55, %v674_v43 }
 0x12b   : > { %v593_v60 = vadd.f32 %v592_v54, %v1895_v57  ;;  %v696_v1 = vmax.f32 %v694_v59, %v695_v49 }
 0x12c   : > { %v628_v0 = vadd.f32 %v627_v58, %v613_v56  ;;  %v676_v3 = vrot.slane %v675_v61, 4 }
 0x12d   : > { %v594_v2 = vadd.f32 %v593_v60, %v570_v5  ;;  %v697_v6 = vrot.slane %v696_v1, 4 }
 0x12e   : > { %v629_v4 = vadd.f32 %v628_v0, %v614_v62  ;;  %v677_v30 = vmax.f32 %v675_v61, %v676_v3 }
 0x12f   : > { %v595_v8 = vadd.f32 %v1891_v51, %v594_v2  ;;  %v698_v11 = vmax.f32 %v696_v1, %v697_v6 }
 0x130   : > { %v630_v10 = vadd.f32 %v629_v4, %v615_v35  ;;  %v678_v14 = vrot.slane %v677_v30, 2 }
 0x131   : > { %v596_v12 = vadd.f32 %v1898_v63, %v595_v8  ;;  %v699_v57 = vrot.slane %v698_v11, 2 }
 0x132   : > { %v631_v15 = vadd.f32 %v630_v10, %v616_v9  ;;  %v679_v17 = vmax.f32 %v677_v30, %v678_v14 }
 0x133   : > { %v597_v16 = vrot.slane %v596_v12, 4  ;;  %v700_v20 = vmax.f32 %v698_v11, %v699_v57 }
 0x134   : > { %v632_v19 = vadd.f32 %v631_v15, %v617_v33  ;;  %v680_v21 = vrot.slane %v679_v17, 1 }
 0x135   : > { %v598_v5 = vadd.f32 %v597_v16, %v596_v12  ;;  %v701_v22 = vrot.slane %v700_v20, 1 }
 0x136   : > { %v633_v7 = vadd.f32 %v632_v19, %v618_v18  ;;  %v681_v51 = vmax.f32 %v679_v17, %v680_v21 }
 0x137   : > { %v599_v23 = vrot.slane %v598_v5, 2  ;;  %v702_v25 = vmax.f32 %v700_v20, %v701_v22 }
 0x138   : > { %v634_v24 = vrot.slane %v633_v7, 4 }
 0x139   : > { %v600_v27 = vadd.f32 %v599_v23, %v598_v5  ;;  %v703_v29 = vsel %vm640_vm0, %v681_v51, %v702_v25 }
 0x13a   : > { %v635_v28 = vadd.f32 %v634_v24, %v633_v7  ;;  %v705_v63 = vmax.f32 %v704_v26, %v703_v29 }
 0x13b   : > { %v601_v32 = vrot.slane %v600_v27, 1 }
 0x13c   : > { %v636_v13 = vrot.slane %v635_v28, 2  ;;  %706 = vst [vmem:[%s1786_s8] sm:$0x3] %v705_v63 }
 0x13d   : > { %v602_v37 = vadd.f32 %v601_v32, %v600_v27 }
 0x13e   : > { %v637_v36 = vadd.f32 %v636_v13, %v635_v28 }
 0x140   : > { %v638_v34 = vrot.slane %v637_v36, 1 }
 0x142   : > { %v639_v38 = vadd.f32 %v638_v34, %v637_v36 }
 0x144   : > { %v641_v40 = vsel %vm640_vm0, %v602_v37, %v639_v38 }
 0x145   : > { %v643_v41 = vadd.f32 %v642_v39, %v641_v40 }
 0x147   : > { %644 = vst [vmem:[%s1781_s30] sm:$0x3] %v643_v41 }
 0x148 PF: > { %p1368_p9 = scmp.le.s32.totalorder %s1799_s15, 300 }
 0x149   : > { %v1665_v42 = vld [vmem:[%s2311_s1] sm:$0xff] (!%p1368_p9)   ;;  %v804_v43 = vlaneseq (!%p1368_p9)  ;;  %v1666_v44 = vld [vmem:[%s2311_s1 + $0x8] sm:$0xff] (!%p1368_p9)   ;;  %v1947_v45 = vstv (!%p1368_p9), %s1406_s14  ;;  %v1667_v47 = vld [vmem:[%s2311_s1 + $0x10] sm:$0xff] (!%p1368_p9)  }
 0x14a   : > { %709 = sbr.rel (%p1368_p9) target bundleno = 629 (0x275), region = 48  ;;  %1550 = vmatprep.subr.bf16.mxu0 (!%p1368_p9), %v1665_v42  ;;  %1598 = vmatprep.subr.bf16.mxu1 (!%p1368_p9), %v1665_v42  ;;  %v1668_v52 = vld [vmem:[%s2311_s1 + $0x18] sm:$0xff] (!%p1368_p9)   ;;  %v1441_v53 = vld [vmem:[%s1791_s13] sm:$0xff] (!%p1368_p9)   ;;  %v1479_v58 = vld [vmem:[%s1791_s13 + $0x8] sm:$0xff] (!%p1368_p9)  }
 0x14b   : > { %v1949_v46 = vshrl.u32 (!%p1368_p9), %v804_v43, 7  ;;  %1551 = vmatpush3.bf16.msra.mxu0 (!%p1368_p9), %v1665_v42  ;;  %1606 = vmatpush3.bf16.msra.mxu1 (!%p1368_p9), %v1665_v42  ;;  %v1970_v54 = vld [vmem:[%s2312_s2] ss:$0 sm:$0xff] (!%p1368_p9)  ;;  %v1442_v55 = vunpack.c.l.bf16 (!%p1368_p9), %v1441_v53  ;;  %v1443_v56 = vunpack.c.h.bf16 (!%p1368_p9), %v1441_v53  ;;  %v1446_v0 = vunpack.c.l.bf16 (!%p1368_p9), %v1479_v58  ;;  %v1483_v19 = vld [vmem:[%s1791_s13 + $0x28] sm:$0xff] (!%p1368_p9)   ;;  %v1480_v7 = vld [vmem:[%s1791_s13 + $0x10] sm:$0xff] (!%p1368_p9)  }
 0x14c   : > { %1552 = vmatprep.subr.bf16.mxu0 (!%p1368_p9), %v1666_v44  ;;  %1599 = vmatprep.subr.bf16.mxu1 (!%p1368_p9), %v1666_v44  ;;  %v1482_v61 = vld [vmem:[%s1791_s13 + $0x20] sm:$0xff] (!%p1368_p9)   ;;  %v1447_v35 = vunpack.c.h.bf16 (!%p1368_p9), %v1479_v58  ;;  %v1670_v22 = vld [vmem:[%s2311_s1 + $0x28] sm:$0xff] (!%p1368_p9)   ;;  %v1462_v28 = vunpack.c.l.bf16 (!%p1368_p9), %v1483_v19  ;;  %v1463_v29 = vunpack.c.h.bf16 (!%p1368_p9), %v1483_v19  ;;  %v1450_v34 = vunpack.c.l.bf16 (!%p1368_p9), %v1480_v7  ;;  %v1671_v41 = vld [vmem:[%s2311_s1 + $0x30] sm:$0xff] (!%p1368_p9)  }
 0x14d   : > { %v806_v48 = vadd.s32 (!%p1368_p9), 8, %v1949_v46  ;;  %v1957_v49 = vadd.s32 (!%p1368_p9), %v1947_v45, %v1949_v46  ;;  %v807_v31 = vadd.s32 (!%p1368_p9), 16, %v1949_v46  ;;  %v808_v59 = vadd.s32 (!%p1368_p9), 24, %v1949_v46  ;;  %v1982_v62 = vld [vmem:[%s2313_s3] ss:$0 sm:$0xff] (!%p1368_p9)  ;;  %v1481_v53 = vld [vmem:[%s1791_s13 + $0x18] sm:$0xff] (!%p1368_p9)  }
 0x14e   : > { %v1458_v1 = vunpack.c.l.bf16 (!%p1368_p9), %v1482_v61  ;;  %v1459_v2 = vunpack.c.h.bf16 (!%p1368_p9), %v1482_v61  ;;  %v749_v3 = vmul.f32 (!%p1368_p9), %v1442_v55, %v1970_v54  ;;  %v750_v4 = vmul.f32 (!%p1368_p9), %v1443_v56, %v1970_v54  ;;  %v1669_v8 = vld [vmem:[%s2311_s1 + $0x20] sm:$0xff] (!%p1368_p9)  }
 0x14f   : > { %1553 = vmatpush3.bf16.msra.mxu0 (!%p1368_p9), %v1666_v44  ;;  %1607 = vmatpush3.bf16.msra.mxu1 (!%p1368_p9), %v1666_v44  ;;  %v1961_v50 = vadd.s32 (!%p1368_p9), %v1947_v45, %v806_v48  ;;  %vm839_vm1 = vcmp.lt.s32.totalorder (!%p1368_p9), %v1957_v49, 300  ;;  %v1976_v60 = vadd.s32 (!%p1368_p9), %v1947_v45, %v807_v31  ;;  %v813_v6 = vadd.s32 (!%p1368_p9), 64, %v1949_v46 }
 0x150   : > { %1554 = vmatprep.subr.bf16.mxu0 (!%p1368_p9), %v1667_v47  ;;  %1600 = vmatprep.subr.bf16.mxu1 (!%p1368_p9), %v1667_v47  ;;  %v751_v30 = vmul.f32 (!%p1368_p9), %v1446_v0, %v1970_v54  ;;  %v752_v9 = vmul.f32 (!%p1368_p9), %v1447_v35, %v1970_v54  ;;  %v757_v10 = vmul.f32 (!%p1368_p9), %v1458_v1, %v1970_v54  ;;  %v814_v11 = vadd.s32 (!%p1368_p9), 72, %v1949_v46  ;;  %v1484_v35 = vld [vmem:[%s1791_s13 + $0x30] sm:$0xff] (!%p1368_p9)   ;;  %v1672_v1 = vld [vmem:[%s2311_s1 + $0x38] sm:$0xff] (!%p1368_p9)  }
 0x151   : > { %vm840_vm2 = vcmp.lt.s32.totalorder %v1961_v50, 300  ;;  %v772_v12 = vadd.f32 %v1982_v62, %v749_v3  ;;  %v773_v14 = vadd.f32 %v1982_v62, %v750_v4  ;;  %v758_v33 = vmul.f32 %v1459_v2, %v1970_v54 }
 0x152   : > { %v1999_v15 = vadd.s32 %v1947_v45, %v813_v6  ;;  %v774_v57 = vadd.f32 %v1982_v62, %v751_v30  ;;  %v775_v16 = vadd.f32 %v1982_v62, %v752_v9  ;;  %v780_v17 = vadd.f32 %v1982_v62, %v757_v10  ;;  %vm2022_vm5 = vmpackc.low %vm840_vm2, %vm839_vm1 }
 0x153   : > { %1555 = vmatpush3.bf16.msra.mxu0 %v1667_v47  ;;  %1608 = vmatpush3.bf16.msra.mxu1 %v1667_v47  ;;  %v2005_v18 = vadd.s32 %v1947_v45, %v814_v11  ;;  %v788_v20 = vmax.f32 %v772_v12, 0.0  ;;  %v789_v5 = vmax.f32 %v773_v14, 0.0  ;;  %v781_v21 = vadd.f32 %v1982_v62, %v758_v33 }
 0x154   : > { %1556 = vmatprep.subr.bf16.mxu0 %v1668_v52  ;;  %1601 = vmatprep.subr.bf16.mxu1 %v1668_v52  ;;  %vm847_vm3 = vcmp.lt.s32.totalorder %v1999_v15, 300  ;;  %v790_v23 = vmax.f32 %v774_v57, 0.0  ;;  %v2015_v24 = vadd.s32 %v1947_v45, %v808_v59  ;;  %v796_v51 = vmax.f32 %v780_v17, 0.0 }
 0x155   : > { %vm2316_vm4 = vcmp.lt.s32.totalorder %v2005_v18, 300  ;;  %v1381_v26 = vpack.c.bf16 %v789_v5, %v788_v20  ;;  %v797_v27 = vmax.f32 %v781_v21, 0.0  ;;  %v791_v63 = vmax.f32 %v775_v16, 0.0  ;;  %v1485_v20 = vld [vmem:[%s1791_s13 + $0x38] sm:$0xff]  }
 0x156   : > { %vm2030_vm6 = vmpackc.low %vm2316_vm4, %vm847_vm3  ;;  %v815_v32 = vadd.s32 80, %v1949_v46  ;;  %v816_v36 = vadd.s32 88, %v1949_v46  ;;  %v759_v38 = vmul.f32 %v1462_v28, %v1970_v54  ;;  %v760_v39 = vmul.f32 %v1463_v29, %v1970_v54 }
 0x157   : > { %1557 = vmatpush3.bf16.msra.mxu0 %v1668_v52  ;;  %1609 = vmatpush3.bf16.msra.mxu1 %v1668_v52  ;;  %v1393_v37 = vpack.c.bf16 %v797_v27, %v796_v51  ;;  %v1451_v40 = vunpack.c.h.bf16 %v1480_v7  ;;  %v753_v43 = vmul.f32 %v1450_v34, %v1970_v54  ;;  %v809_v44 = vadd.s32 32, %v1949_v46 }
 0x158   : > { %1558 = vmatprep.subr.bf16.mxu0 %v1669_v8  ;;  %1602 = vmatprep.subr.bf16.mxu1 %v1669_v8  ;;  %v2042_v42 = vadd.s32 %v1947_v45, %v815_v32  ;;  %v782_v47 = vadd.f32 %v1982_v62, %v759_v38  ;;  %v783_v48 = vadd.f32 %v1982_v62, %v760_v39  ;;  %v810_v52 = vadd.s32 40, %v1949_v46 }
 0x159   : > { %1566 = vmatprep.mubr.msk.bf16.mxu0 %vm2022_vm5, %v1381_v26  ;;  %1574 = vmatprep.mubr.msk.bf16.mxu1 %vm2030_vm6, %v1393_v37  ;;  %v754_v31 = vmul.f32 %v1451_v40, %v1970_v54  ;;  %vm841_vm7 = vcmp.lt.s32.totalorder %v1976_v60, 300  ;;  %vm842_vm8 = vcmp.lt.s32.totalorder %v2015_v24, 300  ;;  %v1384_v55 = vpack.c.bf16 %v791_v63, %v790_v23 }
 0x15a   : > { %v776_v56 = vadd.f32 %v1982_v62, %v753_v43  ;;  %v798_v58 = vmax.f32 %v782_v47, 0.0  ;;  %v2059_v59 = vadd.s32 %v1947_v45, %v816_v36  ;;  %v2063_v0 = vadd.s32 %v1947_v45, %v809_v44  ;;  %vm2095_vm13 = vmpackc.low %vm842_vm8, %vm841_vm7 }
 0x15b   : > { %1559 = vmatpush3.bf16.msra.mxu0 %v1669_v8  ;;  %1610 = vmatpush3.bf16.msra.mxu1 %v1669_v8  ;;  %v777_v61 = vadd.f32 %v1982_v62, %v754_v31  ;;  %v799_v2 = vmax.f32 %v783_v48, 0.0  ;;  %v2070_v3 = vadd.s32 %v1947_v45, %v810_v52  ;;  %v1454_v4 = vunpack.c.l.bf16 %v1481_v53 }
 0x15c   : > { %1560 = vmatprep.subr.bf16.mxu0 %v1670_v22  ;;  %1603 = vmatprep.subr.bf16.mxu1 %v1670_v22  ;;  %v1455_v6 = vunpack.c.h.bf16 %v1481_v53  ;;  %vm849_vm9 = vcmp.lt.s32.totalorder %v2042_v42, 300  ;;  %v792_v8 = vmax.f32 %v776_v56, 0.0  ;;  %v811_v9 = vadd.s32 48, %v1949_v46 }
 0x15d   : > { %v793_v30 = vmax.f32 %v777_v61, 0.0  ;;  %v755_v10 = vmul.f32 %v1454_v4, %v1970_v54  ;;  %v812_v12 = vadd.s32 56, %v1949_v46  ;;  %v1466_v14 = vunpack.c.l.bf16 %v1484_v35 }
 0x15e   : > { %v756_v11 = vmul.f32 %v1455_v6, %v1970_v54  ;;  %vm850_vm10 = vcmp.lt.s32.totalorder %v2059_v59, 300  ;;  %vm843_vm11 = vcmp.lt.s32.totalorder %v2063_v0, 300  ;;  %v1467_v33 = vunpack.c.h.bf16 %v1484_v35 }
 0x15f   : > { %1561 = vmatpush3.bf16.msra.mxu0 %v1670_v22  ;;  %1611 = vmatpush3.bf16.msra.mxu1 %v1670_v22  ;;  %v817_v57 = vadd.s32 96, %v1949_v46  ;;  %v1396_v16 = vpack.c.bf16 %v799_v2, %v798_v58  ;;  %vm2317_vm12 = vcmp.lt.s32.totalorder %v2070_v3, 300  ;;  %v2082_v17 = vadd.s32 %v1947_v45, %v811_v9  ;;  %vm1395_vm14 = vmpackc.low %vm850_vm10, %vm849_vm9 }
 0x160   : > { %1562 = vmatprep.subr.bf16.mxu0 %v1671_v41  ;;  %1604 = vmatprep.subr.bf16.mxu1 %v1671_v41  ;;  %v818_v19 = vadd.s32 104, %v1949_v46  ;;  %v1387_v5 = vpack.c.bf16 %v793_v30, %v792_v8  ;;  %v761_v21 = vmul.f32 %v1466_v14, %v1970_v54  ;;  %v762_v7 = vmul.f32 %v1467_v33, %v1970_v54  ;;  %vm2118_vm0 = vmpackc.low %vm2317_vm12, %vm843_vm11 }
 0x161   : > { %v2089_v22 = vadd.s32 %v1947_v45, %v817_v57  ;;  %v778_v51 = vadd.f32 %v1982_v62, %v755_v10  ;;  %v779_v25 = vadd.f32 %v1982_v62, %v756_v11  ;;  %v2102_v26 = vadd.s32 %v1947_v45, %v812_v12 }
 0x162   : > { %v2105_v27 = vadd.s32 %v1947_v45, %v818_v19  ;;  %v784_v28 = vadd.f32 %v1982_v62, %v761_v21  ;;  %v785_v29 = vadd.f32 %v1982_v62, %v762_v7  ;;  %v1470_v63 = vunpack.c.l.bf16 %v1485_v20 }
 0x163   : > { %1563 = vmatpush3.bf16.msra.mxu0 %v1671_v41  ;;  %1612 = vmatpush3.bf16.msra.mxu1 %v1671_v41  ;;  %vm851_vm15 = vcmp.lt.s32.totalorder %v2089_v22, 300  ;;  %vm845_vm5 = vcmp.lt.s32.totalorder %v2082_v17, 300  ;;  %v1471_v32 = vunpack.c.h.bf16 %v1485_v20  ;;  %v819_v36 = vadd.s32 112, %v1949_v46 }
 0x164   : > { %1564 = vmatprep.subr.bf16.mxu0 %v1672_v1  ;;  %1605 = vmatprep.subr.bf16.mxu1 %v1672_v1  ;;  %vm2318_vm6 = vcmp.lt.s32.totalorder %v2105_v27, 300  ;;  %v800_v34 = vmax.f32 %v784_v28, 0.0  ;;  %v801_v37 = vmax.f32 %v785_v29, 0.0  ;;  %v763_v38 = vmul.f32 %v1470_v63, %v1970_v54 }
 0x165   : > { %v820_v39 = vadd.s32 120, %v1949_v46  ;;  %v794_v40 = vmax.f32 %v778_v51, 0.0  ;;  %v795_v41 = vmax.f32 %v779_v25, 0.0  ;;  %vm1398_vm4 = vmpackc.low %vm2318_vm6, %vm851_vm15  ;;  %v764_v43 = vmul.f32 %v1471_v32, %v1970_v54 }
 0x166   : > { %v2135_v44 = vadd.s32 %v1947_v45, %v819_v36  ;;  %vm846_vm12 = vcmp.lt.s32.totalorder %v2102_v26, 300  ;;  %v1399_v46 = vpack.c.bf16 %v801_v37, %v800_v34  ;;  %v786_v47 = vadd.f32 %v1982_v62, %v763_v38 }
 0x167   : > { %1565 = vmatpush3.bf16.msra.mxu0 %v1672_v1  ;;  %1613 = vmatpush3.bf16.msra.mxu1 %v1672_v1  ;;  %v2142_v48 = vadd.s32 %v1947_v45, %v820_v39  ;;  %v787_v31 = vadd.f32 %v1982_v62, %v764_v43  ;;  %v1390_v52 = vpack.c.bf16 %v795_v41, %v794_v40 }
 0x168   : > { %v802_v54 = vmax.f32 %v786_v47, 0.0 }
 0x169   : > { %v803_v53 = vmax.f32 %v787_v31, 0.0 }
 0x16a   : > { %1567 = vmatmul.mubr.msk.bf16.vlgmr.msra.gmra.mrb[0].mxu0 %vm2095_vm13, %v1384_v55  ;;  %1575 = vmatmul.mubr.msk.bf16.vlgmr.msra.gmra.mrb[0].mxu1 %vm1395_vm14, %v1396_v16  ;;  %vm853_vm13 = vcmp.lt.s32.totalorder %v2135_v44, 300  ;;  %vm854_vm14 = vcmp.lt.s32.totalorder %v2142_v48, 300 }
 0x16b   : > { %1570 = vmatprep.mubr.msk.bf16.mxu0 %vm2118_vm0, %v1387_v5  ;;  %1578 = vmatprep.mubr.msk.bf16.mxu1 %vm1398_vm4, %v1399_v46  ;;  %vm1389_vm0 = vmpackc.low %vm846_vm12, %vm845_vm5  ;;  %v1402_v45 = vpack.c.bf16 %v803_v53, %v802_v54 }
 0x16c   : > { %vm1401_vm6 = vmpackc.low %vm854_vm14, %vm853_vm13 }
 0x172   : > { %1571 = vmatmul.mubr.msk.bf16.gmra.mrb[4].mxu0 %vm1389_vm0, %v1390_v52  ;;  %1579 = vmatmul.mubr.msk.bf16.gmra.mrb[4].mxu1 %vm1401_vm6, %v1402_v45 }
 0x23d   : > { %v1568_v62 = vpop.f32.mrb[0].mxu0  ;;  %v2155_v55 = vpop.f32.mrb[0].mxu1 }
 0x23e   : > { %v1153_v56 = vsub.f32 0.0, %v1568_v62  ;;  %v1009_v58 = vpop.f32.mrb[1].mxu0  ;;  %v2157_v61 = vpop.f32.mrb[1].mxu1  ;;  %v1095_v35 = vmul.f32 %v1568_v62, %v1568_v62  ;;  %v1137_v6 = vsel %vm841_vm7, %v1568_v62, -inf  ;;  %v2167_v10 = vmul.f32 %v2155_v55, %v2155_v55 }
 0x23f   : > { %v1151_v1 = vsub.f32 0.0, %v1009_v58  ;;  %v1569_v2 = vpop.f32.mrb[2].mxu0  ;;  %v2159_v4 = vpop.f32.mrb[2].mxu1  ;;  %v1093_v8 = vmul.f32 %v1009_v58, %v1009_v58  ;;  %v1135_v12 = vsel %vm839_vm1, %v1009_v58, -inf  ;;  %v1145_v57 = vsel %vm849_vm9, %v2155_v55, -inf }
 0x240   : > { %v1154_v30 = vsub.f32 0.0, %v1569_v2  ;;  %v2163_v9 = vpop.f32.mrb[3].mxu0  ;;  %v2169_v11 = vpop.f32.mrb[3].mxu1  ;;  %v1169_v16 = vsel %vm841_vm7, %v1153_v56, -inf  ;;  %v1096_v19 = vmul.f32 %v1569_v2, %v1569_v2  ;;  %v1138_v20 = vsel %vm842_vm8, %v1569_v2, -inf }
 0x241   : > { %v1072_v14 = vadd.f32 %v2163_v9, %v1009_v58  ;;  %v1094_v33 = vmul.f32 %v2163_v9, %v2163_v9  ;;  %v1161_v5 = vsub.f32 0.0, %v2155_v55  ;;  %v1167_v21 = vsel %vm839_vm1, %v1151_v1, -inf }
 0x242   : > { %v1159_v51 = vsub.f32 0.0, %v2157_v61  ;;  %v1170_v25 = vsel %vm842_vm8, %v1154_v30, -inf  ;;  %v1152_v28 = vsub.f32 0.0, %v2163_v9  ;;  %v2192_v60 = vmul.f32 %v2157_v61, %v2157_v61 }
 0x243   : > { %v1073_v7 = vadd.f32 %v1568_v62, %v1072_v14  ;;  %v1109_v23 = vadd.f32 %v1094_v33, %v1093_v8  ;;  %v1162_v29 = vsub.f32 0.0, %v2159_v4  ;;  %v1177_v49 = vsel %vm849_vm9, %v1161_v5, -inf }
 0x244   : > { %v1143_v32 = vsel %vm847_vm3, %v2157_v61, -inf  ;;  %v1175_v39 = vsel %vm847_vm3, %v1159_v51, -inf  ;;  %v1146_v42 = vsel %vm850_vm10, %v2159_v4, -inf  ;;  %v1136_v0 = vsel %vm840_vm2, %v2163_v9, -inf }
 0x245   : > { %v1110_v63 = vadd.f32 %v1109_v23, %v1095_v35  ;;  %v1572_v13 = vpop.f32.mrb[4].mxu0  ;;  %v1074_v36 = vadd.f32 %v1569_v2, %v1073_v7  ;;  %v2200_v24 = vpop.f32.mrb[4].mxu1  ;;  %v1178_v31 = vsel %vm850_vm10, %v1162_v29, -inf  ;;  %vm2327_vm1 = vcmp.lt.s32.totalorder %v2070_v3, 300 }
 0x246   : > { %v1141_v34 = vsel %vm845_vm5, %v1572_v13, -inf  ;;  %v1157_v37 = vsub.f32 0.0, %v1572_v13  ;;  %v1025_v38 = vpop.f32.mrb[5].mxu0  ;;  %v2209_v40 = vpop.f32.mrb[5].mxu1  ;;  %v1168_v26 = vsel %vm840_vm2, %v1152_v28, -inf  ;;  %vm2328_vm3 = vmmov %vm2327_vm1  ;;  %v1149_v9 = vsel %vm853_vm13, %v2200_v24, -inf }
 0x247   : > { %v1185_v41 = vmax.f32 %v1137_v6, %v1141_v34  ;;  %v1139_v43 = vsel %vm843_vm11, %v1025_v38, -inf  ;;  %v1155_v46 = vsub.f32 0.0, %v1025_v38  ;;  %v1573_v47 = vpop.f32.mrb[6].mxu0  ;;  %v2215_v54 = vpop.f32.mrb[6].mxu1  ;;  %v1097_v52 = vmul.f32 %v1025_v38, %v1025_v38 }
 0x248   : > { %v1173_v15 = vsel %vm845_vm5, %v1157_v37, -inf  ;;  %v1183_v53 = vmax.f32 %v1135_v12, %v1139_v43  ;;  %v1142_v45 = vsel %vm846_vm12, %v1573_v47, -inf  ;;  %v1028_v62 = vpop.f32.mrb[7].mxu0  ;;  %v2221_v56 = vpop.f32.mrb[7].mxu1  ;;  %v1158_v59 = vsub.f32 0.0, %v1573_v47 }
 0x249   : > { %v1206_v58 = vmax.f32 %v1169_v16, %v1173_v15  ;;  %v1189_v35 = vmax.f32 %v1185_v41, %v1145_v57  ;;  %v1171_v1 = vsel %vm843_vm11, %v1155_v46, -inf  ;;  %v1186_v8 = vmax.f32 %v1138_v20, %v1142_v45 }
 0x24a   : > { %v1204_v2 = vmax.f32 %v1167_v21, %v1171_v1  ;;  %v2225_v6 = vmax.f32 %v1183_v53, %v1143_v32  ;;  %v1075_v17 = vadd.f32 %v1074_v36, %v1025_v38  ;;  %v1174_v12 = vsel %vm846_vm12, %v1158_v59, -inf }
 0x24b   : > { %v1210_v30 = vmax.f32 %v1206_v58, %v1177_v49  ;;  %v1098_v14 = vmul.f32 %v1028_v62, %v1028_v62  ;;  %v1111_v33 = vadd.f32 %v1110_v63, %v1096_v19  ;;  %v1207_v7 = vmax.f32 %v1170_v25, %v1174_v12 }
 0x24c   : > { %v1208_v5 = vmax.f32 %v1204_v2, %v1175_v39  ;;  %v1190_v23 = vmax.f32 %v1186_v8, %v1146_v42  ;;  %v1076_v16 = vadd.f32 %v1075_v17, %v1028_v62  ;;  %v1140_v21 = vsel %vm2327_vm1, %v1028_v62, -inf }
 0x24d   : > { %v1112_v57 = vadd.f32 %v1111_v33, %v1097_v52  ;;  %v1156_v20 = vsub.f32 0.0, %v1028_v62  ;;  %v1211_v51 = vmax.f32 %v1207_v7, %v1178_v31  ;;  %v1184_v49 = vmax.f32 %v1136_v0, %v1140_v21 }
 0x24e   : > { %v1077_v29 = vadd.f32 %v1572_v13, %v1076_v16  ;;  %v1099_v19 = vmul.f32 %v1572_v13, %v1572_v13  ;;  %v1100_v63 = vmul.f32 %v1573_v47, %v1573_v47  ;;  %v1165_v37 = vsub.f32 0.0, %v2200_v24 }
 0x24f   : > { %v1113_v25 = vadd.f32 %v1112_v57, %v1098_v14  ;;  %v1172_v32 = vsel %vm2328_vm3, %v1156_v20, -inf  ;;  %v1102_v50 = vmul.f32 %v2169_v11, %v2169_v11  ;;  %v1160_v28 = vsub.f32 0.0, %v2169_v11 }
 0x250   : > { %v1078_v36 = vadd.f32 %v1573_v47, %v1077_v29  ;;  %v1205_v34 = vmax.f32 %v1168_v26, %v1172_v32  ;;  %v1193_v13 = vmax.f32 %v1189_v35, %v1149_v9  ;;  %v1181_v3 = vsel %vm853_vm13, %v1165_v37, -inf }
 0x251   : > { %v1114_v38 = vadd.f32 %v1113_v25, %v1099_v19  ;;  %v1147_v42 = vsel %vm851_vm15, %v2209_v40, -inf  ;;  %v1163_v41 = vsub.f32 0.0, %v2209_v40  ;;  %vm2329_vm2 = vcmp.lt.s32.totalorder %v2005_v18, 300 }
 0x252   : > { %v1079_v39 = vadd.f32 %v1078_v36, %v2157_v61  ;;  %v1144_v46 = vsel %vm2329_vm2, %v2169_v11, -inf  ;;  %v1214_v47 = vmax.f32 %v1210_v30, %v1181_v3  ;;  %v1191_v31 = vmax.f32 %v2225_v6, %v1147_v42  ;;  %vm2330_vm4 = vmmov %vm2329_vm2 }
 0x253   : > { %v1115_v43 = vadd.f32 %v1114_v38, %v1100_v63  ;;  %v1179_v44 = vsel %vm851_vm15, %v1163_v41, -inf  ;;  %v1150_v61 = vsel %vm854_vm14, %v2215_v54, -inf  ;;  %v1166_v52 = vsub.f32 0.0, %v2215_v54 }
 0x254   : > { %v1080_v15 = vadd.f32 %v1079_v39, %v2169_v11  ;;  %v1176_v45 = vsel %vm2330_vm4, %v1160_v28, -inf  ;;  %v1212_v62 = vmax.f32 %v1208_v5, %v1179_v44  ;;  %v1194_v58 = vmax.f32 %v1190_v23, %v1150_v61 }
 0x255   : > { %v1116_v53 = vadd.f32 %v1115_v43, %v2192_v60  ;;  %v1182_v11 = vsel %vm854_vm14, %v1166_v52, -inf  ;;  %vm2331_vm7 = vcmp.lt.s32.totalorder %v2105_v27, 300  ;;  %v1164_v1 = vsub.f32 0.0, %v2221_v56  ;;  %v1226_v43 = vld [vmem:[%s1786_s8] sm:$0x3] }
 0x256   : > { %v1081_v35 = vadd.f32 %v2155_v55, %v1080_v15  ;;  %v1148_v22 = vsel %vm2331_vm7, %v2221_v56, -inf  ;;  %v1196_v2 = vmax.f32 %v1193_v13, %v1194_v58  ;;  %v1215_v6 = vmax.f32 %v1211_v51, %v1182_v11  ;;  %vm2332_vm8 = vmmov %vm2331_vm7 }
 0x257   : > { %v1117_v59 = vadd.f32 %v1116_v53, %v1102_v50  ;;  %v1188_v60 = vmax.f32 %v1184_v49, %v1144_v46  ;;  %v1180_v8 = vsel %vm2332_vm8, %v1164_v1, -inf  ;;  %v1209_v17 = vmax.f32 %v1205_v34, %v1176_v45  ;;  %v1132_v53 = vld [vmem:[%s1781_s30] sm:$0x3] }
 0x258   : > { %v1082_v18 = vadd.f32 %v2159_v4, %v1081_v35  ;;  %v1104_v48 = vmul.f32 %v2159_v4, %v2159_v4  ;;  %v1217_v30 = vmax.f32 %v1214_v47, %v1215_v6  ;;  %v1105_v5 = vmul.f32 %v2209_v40, %v2209_v40 }
 0x259   : > { %v1118_v55 = vadd.f32 %v1117_v59, %v2167_v10  ;;  %v1192_v12 = vmax.f32 %v1188_v60, %v1148_v22  ;;  %v1213_v33 = vmax.f32 %v1209_v17, %v1180_v8  ;;  %v1106_v57 = vmul.f32 %v2221_v56, %v2221_v56 }
 0x25a   : > { %v1083_v14 = vadd.f32 %v1082_v18, %v2209_v40  ;;  %v1107_v20 = vmul.f32 %v2200_v24, %v2200_v24  ;;  %v1108_v49 = vmul.f32 %v2215_v54, %v2215_v54  ;;  %vm1130_vm9 = vcmask 1040384  }
 0x25b   : > { %v1119_v7 = vadd.f32 %v1118_v55, %v1104_v48  ;;  %v1195_v23 = vmax.f32 %v1191_v31, %v1192_v12  ;;  %v1216_v27 = vmax.f32 %v1212_v62, %v1213_v33 }
 0x25c   : > { %v1084_v16 = vadd.f32 %v1083_v14, %v2221_v56 }
 0x25d   : > { %v1120_v0 = vadd.f32 %v1119_v7, %v1105_v5  ;;  %v1197_v4 = vmax.f32 %v1195_v23, %v1196_v2  ;;  %v1218_v21 = vmax.f32 %v1216_v27, %v1217_v30 }
 0x25e   : > { %v1085_v10 = vadd.f32 %v2200_v24, %v1084_v16 }
 0x25f   : > { %v1121_v51 = vadd.f32 %v1120_v0, %v1106_v57  ;;  %v1198_v29 = vrot.slane %v1197_v4, 4  ;;  %v1219_v26 = vrot.slane %v1218_v21, 4 }
 0x260   : > { %v1086_v40 = vadd.f32 %v2215_v54, %v1085_v10 }
 0x261   : > { %v1122_v19 = vadd.f32 %v1121_v51, %v1107_v20  ;;  %v1199_v63 = vmax.f32 %v1197_v4, %v1198_v29  ;;  %v1220_v56 = vmax.f32 %v1218_v21, %v1219_v26 }
 0x262   : > { %v1087_v25 = vrot.slane %v1086_v40, 4 }
 0x263   : > { %v1123_v32 = vadd.f32 %v1122_v19, %v1108_v49  ;;  %v1200_v36 = vrot.slane %v1199_v63, 2  ;;  %v1221_v9 = vrot.slane %v1220_v56, 2 }
 0x264   : > { %v1088_v34 = vadd.f32 %v1087_v25, %v1086_v40 }
 0x265   : > { %v1124_v37 = vrot.slane %v1123_v32, 4  ;;  %v1201_v38 = vmax.f32 %v1199_v63, %v1200_v36  ;;  %v1222_v50 = vmax.f32 %v1220_v56, %v1221_v9 }
 0x266   : > { %v1089_v24 = vrot.slane %v1088_v34, 2 }
 0x267   : > { %v1125_v28 = vadd.f32 %v1124_v37, %v1123_v32  ;;  %v1202_v13 = vrot.slane %v1201_v38, 1  ;;  %v1223_v3 = vrot.slane %v1222_v50, 1 }
 0x268   : > { %v1090_v39 = vadd.f32 %v1089_v24, %v1088_v34 }
 0x269   : > { %v1126_v54 = vrot.slane %v1125_v28, 2  ;;  %v1203_v42 = vmax.f32 %v1201_v38, %v1202_v13  ;;  %v1224_v41 = vmax.f32 %v1222_v50, %v1223_v3 }
 0x26a   : > { %v1091_v46 = vrot.slane %v1090_v39, 1 }
 0x26b   : > { %v1127_v47 = vadd.f32 %v1126_v54, %v1125_v28  ;;  %v1225_v31 = vsel %vm1130_vm9, %v1203_v42, %v1224_v41 }
 0x26c   : > { %v1227_v44 = vmax.f32 %v1226_v43, %v1225_v31  ;;  %v1092_v61 = vadd.f32 %v1091_v46, %v1090_v39 }
 0x26d   : > { %v1128_v15 = vrot.slane %v1127_v47, 1 }
 0x26e   : > { %1228 = vst [vmem:[%s1786_s8] sm:$0x3] %v1227_v44 }
 0x26f   : > { %v1129_v52 = vadd.f32 %v1128_v15, %v1127_v47 }
 0x271   : > { %v1131_v45 = vsel %vm1130_vm9, %v1092_v61, %v1129_v52 }
 0x272   : > { %v1133_v62 = vadd.f32 %v1132_v53, %v1131_v45 }
 0x274   : > { %1134 = vst [vmem:[%s1781_s30] sm:$0x3] %v1133_v62 }
 0x275 PF: > { %s16_s22 = sadd.s32 1, %s1711_s22   ;;  %s2333_s18 = smov %s1703_s20 }
 0x276   : > { %p13_p10 = scmp.ge.s32.totalorder %s16_s22, 8   ;;  %s2334_s19 = smov %s1707_s21 }
 0x277   : > { %s2335_s20 = smov %s2338_s23  ;;  %s2336_s21 = smov %s2342_s24 }
 0x278   :  { %15 = sbr.rel (!%p13_p10) target bundleno = 3 (0x3), region = 90 }

</bundles_post_ra>
